<compile_context>
chip_gen: v7x
topology: tpu7x:2x2x1
jax: 0.10.0
libtpu: 0.0.40
codegen_flags: <defaults>
</compile_context>

<pallas_src>
import jax
import jax.numpy as jnp
from jax.experimental import pallas as pl
from jax.experimental.pallas import tpu as pltpu


def _make_kernel(H, W, K, Cin, Cout, Cout_p, KKC, KKC_pad, BB):
    HW = H * W
    P = K // 2

    def kernel(x_ref, w_ref, scale_ref, shift_ref, o_ref, patch_ref):
        # x_ref     : (BB, Cin, HW)      f32  flattened NCHW input (no pre-padding)
        # w_ref     : (Cout_p, KKC_pad)  f32  packed weights [conv7 | conv3 | conv5], zero-padded
        # scale_ref : (Cout_p, 1)        f32  gamma / sqrt(var + eps)
        # shift_ref : (Cout_p, 1)        f32  beta - mean*scale + bias*scale
        # o_ref     : (BB, Cout, HW)     f32  NCHW output (spatial flat = lane dense)
        # patch_ref : (KKC_pad, HW)      f32  VMEM scratch: shifted/masked input rows

        # Zero the padded contraction rows every grid step (megacore-safe) so stale VMEM
        # can never leak NaN/Inf into the (zero-weighted) tail of the dot product.
        if KKC_pad > KKC:
            patch_ref[KKC:KKC_pad, :] = jnp.zeros((KKC_pad - KKC, HW), jnp.float32)

        # Per-lane spatial coordinates (computed once; pow-2 W avoids vector int division).
        lane = jax.lax.broadcasted_iota(jnp.int32, (Cin, HW), 1)
        if W & (W - 1) == 0:
            w_idx = lane & (W - 1)
            h_idx = lane >> (W.bit_length() - 1)
        else:
            h_idx = lane // W
            w_idx = lane - h_idx * W

        # Boundary masks for each row/column offset ("same" padding folded into the kernel).
        row_ok, col_ok = {}, {}
        for d in range(-P, P + 1):
            row_ok[d] = (h_idx >= -d) if d < 0 else ((h_idx < H - d) if d > 0 else None)
            col_ok[d] = (w_idx >= -d) if d < 0 else ((w_idx < W - d) if d > 0 else None)

        scale = scale_ref[...]          # (Cout_p, 1)
        shift = shift_ref[...]

        for bb in range(BB):
            x2 = x_ref[bb]              # (Cin, HW) f32

            # Shift-and-mask each of the K*K taps into a lane-dense patch row block.
            for kh in range(K):
                dh = kh - P
                for kw in range(K):
                    dw = kw - P
                    s = dh * W + dw     # flat-index offset of this tap
                    shifted = pltpu.roll(x2, (-s) % HW, axis=1) if (s % HW) else x2
                    parts = [m for m in (row_ok[dh], col_ok[dw]) if m is not None]
                    if parts:
                        ok = parts[0] if len(parts) == 1 else (parts[0] & parts[1])
                        shifted = jnp.where(ok, shifted, 0.0)
                    t = kh * K + kw
                    patch_ref[t * Cin:(t + 1) * Cin, :] = shifted

            # One MXU matmul for all three branches, already in (Cout, HW) orientation.
            acc = jax.lax.dot_general(
                w_ref[...], patch_ref[...],
                dimension_numbers=(((1,), (0,)), ((), ())),
                preferred_element_type=jnp.float32)          # (Cout_p, HW)

            # Fused BN (conv bias folded into shift) + ReLU, f32, lane-dense store.
            y = jnp.maximum(acc * scale + shift, 0.0)
            o_ref[bb] = y[:Cout]

    return kernel


def _pack_params(params, K, eps, cout_pad, kkc_pad):
    """Pack per-branch weights/BN into one matmul weight + fused scale/shift vectors.

    Channel order matches torch.cat((x3, torch.cat((x1, x2), 1)), 1) -> [x3, x1, x2].
    """
    ws, scales, shifts = [], [], []
    for name in ("conv3", "conv1", "conv2"):
        p = params[name]
        k = p["w"].shape[0]
        pad = (K - k) // 2
        ws.append(jnp.pad(p["w"], ((pad, pad), (pad, pad), (0, 0), (0, 0))))
        scale = p["gamma"] / jnp.sqrt(p["var"] + eps)
        shift = p["beta"] - p["mean"] * scale + p["b"] * scale   # conv bias folded in
        scales.append(scale)
        shifts.append(shift)
    w_all = jnp.concatenate(ws, axis=-1)                         # (K, K, Cin, Cout)
    K_, _, Cin, Cout = w_all.shape
    kkc = K_ * K_ * Cin
    # (Cout, KKC): column index = (kh*K + kw)*Cin + c, matching the patch row order.
    w_mat = jnp.transpose(w_all, (3, 0, 1, 2)).reshape(Cout, kkc)
    w_mat = jnp.pad(w_mat, ((0, cout_pad - Cout), (0, kkc_pad - kkc))).astype(jnp.float32)
    scale_all = jnp.pad(jnp.concatenate(scales), (0, cout_pad - Cout)).reshape(cout_pad, 1)
    shift_all = jnp.pad(jnp.concatenate(shifts), (0, cout_pad - Cout)).reshape(cout_pad, 1)
    return w_mat, scale_all, shift_all


def multiscale_layer(x_nchw, params, eps=1e-5):
    """x_nchw: (B, Cin, H, W) like PyTorch. Returns NCHW (B, 3*Cb, H, W), order [x3, x1, x2]."""
    B, Cin, H, W = x_nchw.shape
    K = 7
    HW = H * W
    Cb = params["conv1"]["w"].shape[-1]
    Cout = 3 * Cb
    Cout_p = ((Cout + 7) // 8) * 8          # sublane-aligned accumulator
    KKC = K * K * Cin
    KKC_pad = ((KKC + 127) // 128) * 128    # lane/tile-aligned contraction dim

    # Images per grid step: amortize per-step overhead, but keep >= 2 grid steps so the
    # v7x megacore still splits the batch across both TensorCores.
    BB = 1
    for cand in (8, 4, 2):
        if B % cand == 0 and B // cand >= 2:
            BB = cand
            break

    x_flat = x_nchw.reshape(B, Cin, HW)     # pure reshape: no transpose/pad launches
    w_mat, scale_all, shift_all = _pack_params(params, K, eps, Cout_p, KKC_pad)

    out = pl.pallas_call(
        _make_kernel(H, W, K, Cin, Cout, Cout_p, KKC, KKC_pad, BB),
        out_shape=jax.ShapeDtypeStruct((B, Cout, HW), jnp.float32),
        grid_spec=pltpu.PrefetchScalarGridSpec(
            num_scalar_prefetch=0,
            grid=(B // BB,),
            in_specs=[
                pl.BlockSpec((BB, Cin, HW), lambda i: (i, 0, 0)),
                pl.BlockSpec((Cout_p, KKC_pad), lambda i: (0, 0)),
                pl.BlockSpec((Cout_p, 1), lambda i: (0, 0)),
                pl.BlockSpec((Cout_p, 1), lambda i: (0, 0)),
            ],
            out_specs=pl.BlockSpec((BB, Cout, HW), lambda i: (i, 0, 0)),
            scratch_shapes=[pltpu.VMEM((KKC_pad, HW), jnp.float32)],
        ),
        compiler_params=pltpu.CompilerParams(
            dimension_semantics=("parallel",)),   # v7x: both TensorCores split the batch grid
    )(x_flat, w_mat, scale_all, shift_all)

    # TODO(synk): for large H*W, tile over rows (halo of K-1) instead of whole-image lanes and
    # size blocks against v7x's 64 MiB VMEM (set vmem_limit_bytes); trivial at these shapes.
    return out.reshape(B, Cout, H, W)   # NCHW, channel order [x3, x1, x2]


def init_branch_params(key, k, ch_in, ch_branch):
    """Deterministic synthetic parameters for one Conv2d+BN branch (HWIO weights)."""
    kw_, kb_, kg_, kbeta_, km_, kv_ = jax.random.split(key, 6)
    fan_in = ch_in * k * k
    bound = 1.0 / jnp.sqrt(jnp.float32(fan_in))
    w = jax.random.uniform(kw_, (k, k, ch_in, ch_branch), jnp.float32, -bound, bound)
    b = jax.random.uniform(kb_, (ch_branch,), jnp.float32, -bound, bound)
    gamma = 1.0 + 0.1 * jax.random.normal(kg_, (ch_branch,), jnp.float32)
    beta = 0.1 * jax.random.normal(kbeta_, (ch_branch,), jnp.float32)
    running_mean = 0.1 * jax.random.normal(km_, (ch_branch,), jnp.float32)
    running_var = 1.0 + 0.05 * jax.random.uniform(kv_, (ch_branch,), jnp.float32)
    return dict(w=w, b=b, gamma=gamma, beta=beta, mean=running_mean, var=running_var)


def multiscale_layer_reference(x_nchw, params, eps=1e-5):
    """Pure-JAX f32 reference (per-branch conv + eval-mode BN + ReLU, cat [x3, x1, x2])."""
    x = jnp.transpose(x_nchw, (0, 2, 3, 1))
    outs = {}
    for name in ("conv1", "conv2", "conv3"):
        p = params[name]
        y = jax.lax.conv_general_dilated(
            x, p["w"], window_strides=(1, 1), padding="SAME",
            dimension_numbers=("NHWC", "HWIO", "NHWC"),
            precision=jax.lax.Precision.HIGHEST) + p["b"]
        scale = p["gamma"] / jnp.sqrt(p["var"] + eps)
        y = (y - p["mean"]) * scale + p["beta"]
        outs[name] = jnp.maximum(y, 0.0)
    ref = jnp.concatenate([outs["conv3"], outs["conv1"], outs["conv2"]], axis=-1)
    return jnp.transpose(ref, (0, 3, 1, 2))   # NCHW


if __name__ == "__main__":
    B, ch_in, H, W = 2, 4, 16, 16
    ch_out = 12                      # each branch produces ch_out // 3 = 4 channels
    ch_branch = ch_out // 3

    root = jax.random.PRNGKey(0)
    kx, k1, k2, k3 = jax.random.split(root, 4)

    x = jax.random.normal(kx, (B, ch_in, H, W), jnp.float32)   # NCHW, like PyTorch

    params = {
        "conv1": init_branch_params(k1, 3, ch_in, ch_branch),
        "conv2": init_branch_params(k2, 5, ch_in, ch_branch),
        "conv3": init_branch_params(k3, 7, ch_in, ch_branch),
    }

    # TODO(synk): PyTorch BatchNorm2d in train mode uses batch statistics; this kernel
    # implements the deterministic eval-mode normalization with running stats.
    out = jax.block_until_ready(jax.jit(multiscale_layer)(x, params))
    assert out.shape == (B, ch_out, H, W), out.shape
    assert bool(jnp.all(jnp.isfinite(out)))
    assert bool(jnp.all(out >= 0.0))          # post-ReLU

    # Correctness vs pure-JAX f32 reference (f32 operands + f32 MXU accumulation).
    ref = multiscale_layer_reference(x, params)
    max_err = float(jnp.max(jnp.abs(out - ref)))
    assert max_err < 2e-2, max_err

    print("KERNEL_OK")
</pallas_src>

<mosaic_0001>
module attributes {stable_mosaic.version = 11 : i64} {
  func.func @kernel(%arg0: i32, %arg1: memref<1x4x256xf32, #tpu.memory_space<vmem>>, %arg2: memref<16x256xf32, #tpu.memory_space<vmem>>, %arg3: memref<16x1xf32, #tpu.memory_space<vmem>>, %arg4: memref<16x1xf32, #tpu.memory_space<vmem>>, %arg5: memref<1x12x256xf32, #tpu.memory_space<vmem>>, %arg6: memref<256x256xf32, #tpu.memory_space<vmem>>) attributes {dimension_semantics = [#tpu.dimension_semantics<parallel>], iteration_bounds = array<i64: 2>, scalar_prefetch = 0 : i64, scratch_operands = 1 : i64, tpu.core_type = #tpu.core_type<tc>, window_params = [{transform_indices = @transform_0, window_bounds = array<i64: 1, 4, 256>}, {pipeline_mode = #tpu.pipeline_mode<synchronous>, transform_indices = @transform_1, window_bounds = array<i64: 16, 256>}, {pipeline_mode = #tpu.pipeline_mode<synchronous>, transform_indices = @transform_2, window_bounds = array<i64: 16, 1>}, {pipeline_mode = #tpu.pipeline_mode<synchronous>, transform_indices = @transform_3, window_bounds = array<i64: 16, 1>}, {transform_indices = @transform_4, window_bounds = array<i64: 1, 12, 256>}]} {
    %cst = arith.constant 0.000000e+00 : f32
    %0 = vector.broadcast %cst : f32 to vector<60x256xf32>
    %c196 = arith.constant 196 : index
    %c0 = arith.constant 0 : index
    %1 = vector.load %arg6[%c196, %c0] : memref<256x256xf32, #tpu.memory_space<vmem>>, vector<60x256xf32>
    tpu.vector_store %arg6[%c196, %c0], %0 {strides = array<i32>} : memref<256x256xf32, #tpu.memory_space<vmem>>, vector<60x256xf32>,
    %2 = tpu.iota {dimensions = array<i32: 1>} : vector<4x256xi32>
    %c15_i32 = arith.constant 15 : i32
    %3 = vector.broadcast %c15_i32 : i32 to vector<4x256xi32>
    %4 = arith.andi %2, %3 : vector<4x256xi32>
    %c4_i32 = arith.constant 4 : i32
    %5 = vector.broadcast %c4_i32 : i32 to vector<4x256xi32>
    %6 = arith.shrsi %2, %5 : vector<4x256xi32>
    %c3_i32 = arith.constant 3 : i32
    %7 = vector.broadcast %c3_i32 : i32 to vector<4x256xi32>
    %8 = arith.cmpi sge, %6, %7 : vector<4x256xi32>
    %c3_i32_0 = arith.constant 3 : i32
    %9 = vector.broadcast %c3_i32_0 : i32 to vector<4x256xi32>
    %10 = arith.cmpi sge, %4, %9 : vector<4x256xi32>
    %c2_i32 = arith.constant 2 : i32
    %11 = vector.broadcast %c2_i32 : i32 to vector<4x256xi32>
    %12 = arith.cmpi sge, %6, %11 : vector<4x256xi32>
    %c2_i32_1 = arith.constant 2 : i32
    %13 = vector.broadcast %c2_i32_1 : i32 to vector<4x256xi32>
    %14 = arith.cmpi sge, %4, %13 : vector<4x256xi32>
    %c1_i32 = arith.constant 1 : i32
    %15 = vector.broadcast %c1_i32 : i32 to vector<4x256xi32>
    %16 = arith.cmpi sge, %6, %15 : vector<4x256xi32>
    %c1_i32_2 = arith.constant 1 : i32
    %17 = vector.broadcast %c1_i32_2 : i32 to vector<4x256xi32>
    %18 = arith.cmpi sge, %4, %17 : vector<4x256xi32>
    %c15_i32_3 = arith.constant 15 : i32
    %19 = vector.broadcast %c15_i32_3 : i32 to vector<4x256xi32>
    %20 = arith.cmpi slt, %6, %19 : vector<4x256xi32>
    %c15_i32_4 = arith.constant 15 : i32
    %21 = vector.broadcast %c15_i32_4 : i32 to vector<4x256xi32>
    %22 = arith.cmpi slt, %4, %21 : vector<4x256xi32>
    %c14_i32 = arith.constant 14 : i32
    %23 = vector.broadcast %c14_i32 : i32 to vector<4x256xi32>
    %24 = arith.cmpi slt, %6, %23 : vector<4x256xi32>
    %c14_i32_5 = arith.constant 14 : i32
    %25 = vector.broadcast %c14_i32_5 : i32 to vector<4x256xi32>
    %26 = arith.cmpi slt, %4, %25 : vector<4x256xi32>
    %c13_i32 = arith.constant 13 : i32
    %27 = vector.broadcast %c13_i32 : i32 to vector<4x256xi32>
    %28 = arith.cmpi slt, %6, %27 : vector<4x256xi32>
    %c13_i32_6 = arith.constant 13 : i32
    %29 = vector.broadcast %c13_i32_6 : i32 to vector<4x256xi32>
    %30 = arith.cmpi slt, %4, %29 : vector<4x256xi32>
    %c0_7 = arith.constant 0 : index
    %c0_8 = arith.constant 0 : index
    %31 = vector.load %arg3[%c0_7, %c0_8] : memref<16x1xf32, #tpu.memory_space<vmem>>, vector<16x1xf32>
    %c0_9 = arith.constant 0 : index
    %c0_10 = arith.constant 0 : index
    %32 = vector.load %arg4[%c0_9, %c0_10] : memref<16x1xf32, #tpu.memory_space<vmem>>, vector<16x1xf32>
    %c0_11 = arith.constant 0 : index
    %c0_12 = arith.constant 0 : index
    %c0_13 = arith.constant 0 : index
    %33 = vector.load %arg1[%c0_11, %c0_12, %c0_13] : memref<1x4x256xf32, #tpu.memory_space<vmem>>, vector<1x4x256xf32>
    %34 = vector.shape_cast %33 : vector<1x4x256xf32> to vector<4x256xf32>
    %c51_i32 = arith.constant 51 : i32
    %35 = tpu.dynamic_rotate %34 by %c51_i32 dim 1 : vector<4x256xf32>, i32 -> vector<4x256xf32>
    %36 = arith.andi %8, %10 : vector<4x256xi1>
    %cst_14 = arith.constant 0.000000e+00 : f32
    %37 = vector.broadcast %cst_14 : f32 to vector<4x256xf32>
    %38 = arith.select %36, %35, %37 : vector<4x256xi1>, vector<4x256xf32>
    %c0_15 = arith.constant 0 : index
    %c0_16 = arith.constant 0 : index
    %39 = vector.load %arg6[%c0_15, %c0_16] : memref<256x256xf32, #tpu.memory_space<vmem>>, vector<4x256xf32>
    tpu.vector_store %arg6[%c0_15, %c0_16], %38 {strides = array<i32>} : memref<256x256xf32, #tpu.memory_space<vmem>>, vector<4x256xf32>,
    %c50_i32 = arith.constant 50 : i32
    %40 = tpu.dynamic_rotate %34 by %c50_i32 dim 1 : vector<4x256xf32>, i32 -> vector<4x256xf32>
    %41 = arith.andi %8, %14 : vector<4x256xi1>
    %cst_17 = arith.constant 0.000000e+00 : f32
    %42 = vector.broadcast %cst_17 : f32 to vector<4x256xf32>
    %43 = arith.select %41, %40, %42 : vector<4x256xi1>, vector<4x256xf32>
    %c4 = arith.constant 4 : index
    %c0_18 = arith.constant 0 : index
    %44 = vector.load %arg6[%c4, %c0_18] : memref<256x256xf32, #tpu.memory_space<vmem>>, vector<4x256xf32>
    tpu.vector_store %arg6[%c4, %c0_18], %43 {strides = array<i32>} : memref<256x256xf32, #tpu.memory_space<vmem>>, vector<4x256xf32>,
    %c49_i32 = arith.constant 49 : i32
    %45 = tpu.dynamic_rotate %34 by %c49_i32 dim 1 : vector<4x256xf32>, i32 -> vector<4x256xf32>
    %46 = arith.andi %8, %18 : vector<4x256xi1>
    %cst_19 = arith.constant 0.000000e+00 : f32
    %47 = vector.broadcast %cst_19 : f32 to vector<4x256xf32>
    %48 = arith.select %46, %45, %47 : vector<4x256xi1>, vector<4x256xf32>
    %c8 = arith.constant 8 : index
    %c0_20 = arith.constant 0 : index
    %49 = vector.load %arg6[%c8, %c0_20] : memref<256x256xf32, #tpu.memory_space<vmem>>, vector<4x256xf32>
    tpu.vector_store %arg6[%c8, %c0_20], %48 {strides = array<i32>} : memref<256x256xf32, #tpu.memory_space<vmem>>, vector<4x256xf32>,
    %c48_i32 = arith.constant 48 : i32
    %50 = tpu.dynamic_rotate %34 by %c48_i32 dim 1 : vector<4x256xf32>, i32 -> vector<4x256xf32>
    %cst_21 = arith.constant 0.000000e+00 : f32
    %51 = vector.broadcast %cst_21 : f32 to vector<4x256xf32>
    %52 = arith.select %8, %50, %51 : vector<4x256xi1>, vector<4x256xf32>
    %c12 = arith.constant 12 : index
    %c0_22 = arith.constant 0 : index
    %53 = vector.load %arg6[%c12, %c0_22] : memref<256x256xf32, #tpu.memory_space<vmem>>, vector<4x256xf32>
    tpu.vector_store %arg6[%c12, %c0_22], %52 {strides = array<i32>} : memref<256x256xf32, #tpu.memory_space<vmem>>, vector<4x256xf32>,
    %c47_i32 = arith.constant 47 : i32
    %54 = tpu.dynamic_rotate %34 by %c47_i32 dim 1 : vector<4x256xf32>, i32 -> vector<4x256xf32>
    %55 = arith.andi %8, %22 : vector<4x256xi1>
    %cst_23 = arith.constant 0.000000e+00 : f32
    %56 = vector.broadcast %cst_23 : f32 to vector<4x256xf32>
    %57 = arith.select %55, %54, %56 : vector<4x256xi1>, vector<4x256xf32>
    %c16 = arith.constant 16 : index
    %c0_24 = arith.constant 0 : index
    %58 = vector.load %arg6[%c16, %c0_24] : memref<256x256xf32, #tpu.memory_space<vmem>>, vector<4x256xf32>
    tpu.vector_store %arg6[%c16, %c0_24], %57 {strides = array<i32>} : memref<256x256xf32, #tpu.memory_space<vmem>>, vector<4x256xf32>,
    %c46_i32 = arith.constant 46 : i32
    %59 = tpu.dynamic_rotate %34 by %c46_i32 dim 1 : vector<4x256xf32>, i32 -> vector<4x256xf32>
    %60 = arith.andi %8, %26 : vector<4x256xi1>
    %cst_25 = arith.constant 0.000000e+00 : f32
    %61 = vector.broadcast %cst_25 : f32 to vector<4x256xf32>
    %62 = arith.select %60, %59, %61 : vector<4x256xi1>, vector<4x256xf32>
    %c20 = arith.constant 20 : index
    %c0_26 = arith.constant 0 : index
    %63 = vector.load %arg6[%c20, %c0_26] : memref<256x256xf32, #tpu.memory_space<vmem>>, vector<4x256xf32>
    tpu.vector_store %arg6[%c20, %c0_26], %62 {strides = array<i32>} : memref<256x256xf32, #tpu.memory_space<vmem>>, vector<4x256xf32>,
    %c45_i32 = arith.constant 45 : i32
    %64 = tpu.dynamic_rotate %34 by %c45_i32 dim 1 : vector<4x256xf32>, i32 -> vector<4x256xf32>
    %65 = arith.andi %8, %30 : vector<4x256xi1>
    %cst_27 = arith.constant 0.000000e+00 : f32
    %66 = vector.broadcast %cst_27 : f32 to vector<4x256xf32>
    %67 = arith.select %65, %64, %66 : vector<4x256xi1>, vector<4x256xf32>
    %c24 = arith.constant 24 : index
    %c0_28 = arith.constant 0 : index
    %68 = vector.load %arg6[%c24, %c0_28] : memref<256x256xf32, #tpu.memory_space<vmem>>, vector<4x256xf32>
    tpu.vector_store %arg6[%c24, %c0_28], %67 {strides = array<i32>} : memref<256x256xf32, #tpu.memory_space<vmem>>, vector<4x256xf32>,
    %c35_i32 = arith.constant 35 : i32
    %69 = tpu.dynamic_rotate %34 by %c35_i32 dim 1 : vector<4x256xf32>, i32 -> vector<4x256xf32>
    %70 = arith.andi %12, %10 : vector<4x256xi1>
    %cst_29 = arith.constant 0.000000e+00 : f32
    %71 = vector.broadcast %cst_29 : f32 to vector<4x256xf32>
    %72 = arith.select %70, %69, %71 : vector<4x256xi1>, vector<4x256xf32>
    %c28 = arith.constant 28 : index
    %c0_30 = arith.constant 0 : index
    %73 = vector.load %arg6[%c28, %c0_30] : memref<256x256xf32, #tpu.memory_space<vmem>>, vector<4x256xf32>
    tpu.vector_store %arg6[%c28, %c0_30], %72 {strides = array<i32>} : memref<256x256xf32, #tpu.memory_space<vmem>>, vector<4x256xf32>,
    %c34_i32 = arith.constant 34 : i32
    %74 = tpu.dynamic_rotate %34 by %c34_i32 dim 1 : vector<4x256xf32>, i32 -> vector<4x256xf32>
    %75 = arith.andi %12, %14 : vector<4x256xi1>
    %cst_31 = arith.constant 0.000000e+00 : f32
    %76 = vector.broadcast %cst_31 : f32 to vector<4x256xf32>
    %77 = arith.select %75, %74, %76 : vector<4x256xi1>, vector<4x256xf32>
    %c32 = arith.constant 32 : index
    %c0_32 = arith.constant 0 : index
    %78 = vector.load %arg6[%c32, %c0_32] : memref<256x256xf32, #tpu.memory_space<vmem>>, vector<4x256xf32>
    tpu.vector_store %arg6[%c32, %c0_32], %77 {strides = array<i32>} : memref<256x256xf32, #tpu.memory_space<vmem>>, vector<4x256xf32>,
    %c33_i32 = arith.constant 33 : i32
    %79 = tpu.dynamic_rotate %34 by %c33_i32 dim 1 : vector<4x256xf32>, i32 -> vector<4x256xf32>
    %80 = arith.andi %12, %18 : vector<4x256xi1>
    %cst_33 = arith.constant 0.000000e+00 : f32
    %81 = vector.broadcast %cst_33 : f32 to vector<4x256xf32>
    %82 = arith.select %80, %79, %81 : vector<4x256xi1>, vector<4x256xf32>
    %c36 = arith.constant 36 : index
    %c0_34 = arith.constant 0 : index
    %83 = vector.load %arg6[%c36, %c0_34] : memref<256x256xf32, #tpu.memory_space<vmem>>, vector<4x256xf32>
    tpu.vector_store %arg6[%c36, %c0_34], %82 {strides = array<i32>} : memref<256x256xf32, #tpu.memory_space<vmem>>, vector<4x256xf32>,
    %c32_i32 = arith.constant 32 : i32
    %84 = tpu.dynamic_rotate %34 by %c32_i32 dim 1 : vector<4x256xf32>, i32 -> vector<4x256xf32>
    %cst_35 = arith.constant 0.000000e+00 : f32
    %85 = vector.broadcast %cst_35 : f32 to vector<4x256xf32>
    %86 = arith.select %12, %84, %85 : vector<4x256xi1>, vector<4x256xf32>
    %c40 = arith.constant 40 : index
    %c0_36 = arith.constant 0 : index
    %87 = vector.load %arg6[%c40, %c0_36] : memref<256x256xf32, #tpu.memory_space<vmem>>, vector<4x256xf32>
    tpu.vector_store %arg6[%c40, %c0_36], %86 {strides = array<i32>} : memref<256x256xf32, #tpu.memory_space<vmem>>, vector<4x256xf32>,
    %c31_i32 = arith.constant 31 : i32
    %88 = tpu.dynamic_rotate %34 by %c31_i32 dim 1 : vector<4x256xf32>, i32 -> vector<4x256xf32>
    %89 = arith.andi %12, %22 : vector<4x256xi1>
    %cst_37 = arith.constant 0.000000e+00 : f32
    %90 = vector.broadcast %cst_37 : f32 to vector<4x256xf32>
    %91 = arith.select %89, %88, %90 : vector<4x256xi1>, vector<4x256xf32>
    %c44 = arith.constant 44 : index
    %c0_38 = arith.constant 0 : index
    %92 = vector.load %arg6[%c44, %c0_38] : memref<256x256xf32, #tpu.memory_space<vmem>>, vector<4x256xf32>
    tpu.vector_store %arg6[%c44, %c0_38], %91 {strides = array<i32>} : memref<256x256xf32, #tpu.memory_space<vmem>>, vector<4x256xf32>,
    %c30_i32 = arith.constant 30 : i32
    %93 = tpu.dynamic_rotate %34 by %c30_i32 dim 1 : vector<4x256xf32>, i32 -> vector<4x256xf32>
    %94 = arith.andi %12, %26 : vector<4x256xi1>
    %cst_39 = arith.constant 0.000000e+00 : f32
    %95 = vector.broadcast %cst_39 : f32 to vector<4x256xf32>
    %96 = arith.select %94, %93, %95 : vector<4x256xi1>, vector<4x256xf32>
    %c48 = arith.constant 48 : index
    %c0_40 = arith.constant 0 : index
    %97 = vector.load %arg6[%c48, %c0_40] : memref<256x256xf32, #tpu.memory_space<vmem>>, vector<4x256xf32>
    tpu.vector_store %arg6[%c48, %c0_40], %96 {strides = array<i32>} : memref<256x256xf32, #tpu.memory_space<vmem>>, vector<4x256xf32>,
    %c29_i32 = arith.constant 29 : i32
    %98 = tpu.dynamic_rotate %34 by %c29_i32 dim 1 : vector<4x256xf32>, i32 -> vector<4x256xf32>
    %99 = arith.andi %12, %30 : vector<4x256xi1>
    %cst_41 = arith.constant 0.000000e+00 : f32
    %100 = vector.broadcast %cst_41 : f32 to vector<4x256xf32>
    %101 = arith.select %99, %98, %100 : vector<4x256xi1>, vector<4x256xf32>
    %c52 = arith.constant 52 : index
    %c0_42 = arith.constant 0 : index
    %102 = vector.load %arg6[%c52, %c0_42] : memref<256x256xf32, #tpu.memory_space<vmem>>, vector<4x256xf32>
    tpu.vector_store %arg6[%c52, %c0_42], %101 {strides = array<i32>} : memref<256x256xf32, #tpu.memory_space<vmem>>, vector<4x256xf32>,
    %c19_i32 = arith.constant 19 : i32
    %103 = tpu.dynamic_rotate %34 by %c19_i32 dim 1 : vector<4x256xf32>, i32 -> vector<4x256xf32>
    %104 = arith.andi %16, %10 : vector<4x256xi1>
    %cst_43 = arith.constant 0.000000e+00 : f32
    %105 = vector.broadcast %cst_43 : f32 to vector<4x256xf32>
    %106 = arith.select %104, %103, %105 : vector<4x256xi1>, vector<4x256xf32>
    %c56 = arith.constant 56 : index
    %c0_44 = arith.constant 0 : index
    %107 = vector.load %arg6[%c56, %c0_44] : memref<256x256xf32, #tpu.memory_space<vmem>>, vector<4x256xf32>
    tpu.vector_store %arg6[%c56, %c0_44], %106 {strides = array<i32>} : memref<256x256xf32, #tpu.memory_space<vmem>>, vector<4x256xf32>,
    %c18_i32 = arith.constant 18 : i32
    %108 = tpu.dynamic_rotate %34 by %c18_i32 dim 1 : vector<4x256xf32>, i32 -> vector<4x256xf32>
    %109 = arith.andi %16, %14 : vector<4x256xi1>
    %cst_45 = arith.constant 0.000000e+00 : f32
    %110 = vector.broadcast %cst_45 : f32 to vector<4x256xf32>
    %111 = arith.select %109, %108, %110 : vector<4x256xi1>, vector<4x256xf32>
    %c60 = arith.constant 60 : index
    %c0_46 = arith.constant 0 : index
    %112 = vector.load %arg6[%c60, %c0_46] : memref<256x256xf32, #tpu.memory_space<vmem>>, vector<4x256xf32>
    tpu.vector_store %arg6[%c60, %c0_46], %111 {strides = array<i32>} : memref<256x256xf32, #tpu.memory_space<vmem>>, vector<4x256xf32>,
    %c17_i32 = arith.constant 17 : i32
    %113 = tpu.dynamic_rotate %34 by %c17_i32 dim 1 : vector<4x256xf32>, i32 -> vector<4x256xf32>
    %114 = arith.andi %16, %18 : vector<4x256xi1>
    %cst_47 = arith.constant 0.000000e+00 : f32
    %115 = vector.broadcast %cst_47 : f32 to vector<4x256xf32>
    %116 = arith.select %114, %113, %115 : vector<4x256xi1>, vector<4x256xf32>
    %c64 = arith.constant 64 : index
    %c0_48 = arith.constant 0 : index
    %117 = vector.load %arg6[%c64, %c0_48] : memref<256x256xf32, #tpu.memory_space<vmem>>, vector<4x256xf32>
    tpu.vector_store %arg6[%c64, %c0_48], %116 {strides = array<i32>} : memref<256x256xf32, #tpu.memory_space<vmem>>, vector<4x256xf32>,
    %c16_i32 = arith.constant 16 : i32
    %118 = tpu.dynamic_rotate %34 by %c16_i32 dim 1 : vector<4x256xf32>, i32 -> vector<4x256xf32>
    %cst_49 = arith.constant 0.000000e+00 : f32
    %119 = vector.broadcast %cst_49 : f32 to vector<4x256xf32>
    %120 = arith.select %16, %118, %119 : vector<4x256xi1>, vector<4x256xf32>
    %c68 = arith.constant 68 : index
    %c0_50 = arith.constant 0 : index
    %121 = vector.load %arg6[%c68, %c0_50] : memref<256x256xf32, #tpu.memory_space<vmem>>, vector<4x256xf32>
    tpu.vector_store %arg6[%c68, %c0_50], %120 {strides = array<i32>} : memref<256x256xf32, #tpu.memory_space<vmem>>, vector<4x256xf32>,
    %c15_i32_51 = arith.constant 15 : i32
    %122 = tpu.dynamic_rotate %34 by %c15_i32_51 dim 1 : vector<4x256xf32>, i32 -> vector<4x256xf32>
    %123 = arith.andi %16, %22 : vector<4x256xi1>
    %cst_52 = arith.constant 0.000000e+00 : f32
    %124 = vector.broadcast %cst_52 : f32 to vector<4x256xf32>
    %125 = arith.select %123, %122, %124 : vector<4x256xi1>, vector<4x256xf32>
    %c72 = arith.constant 72 : index
    %c0_53 = arith.constant 0 : index
    %126 = vector.load %arg6[%c72, %c0_53] : memref<256x256xf32, #tpu.memory_space<vmem>>, vector<4x256xf32>
    tpu.vector_store %arg6[%c72, %c0_53], %125 {strides = array<i32>} : memref<256x256xf32, #tpu.memory_space<vmem>>, vector<4x256xf32>,
    %c14_i32_54 = arith.constant 14 : i32
    %127 = tpu.dynamic_rotate %34 by %c14_i32_54 dim 1 : vector<4x256xf32>, i32 -> vector<4x256xf32>
    %128 = arith.andi %16, %26 : vector<4x256xi1>
    %cst_55 = arith.constant 0.000000e+00 : f32
    %129 = vector.broadcast %cst_55 : f32 to vector<4x256xf32>
    %130 = arith.select %128, %127, %129 : vector<4x256xi1>, vector<4x256xf32>
    %c76 = arith.constant 76 : index
    %c0_56 = arith.constant 0 : index
    %131 = vector.load %arg6[%c76, %c0_56] : memref<256x256xf32, #tpu.memory_space<vmem>>, vector<4x256xf32>
    tpu.vector_store %arg6[%c76, %c0_56], %130 {strides = array<i32>} : memref<256x256xf32, #tpu.memory_space<vmem>>, vector<4x256xf32>,
    %c13_i32_57 = arith.constant 13 : i32
    %132 = tpu.dynamic_rotate %34 by %c13_i32_57 dim 1 : vector<4x256xf32>, i32 -> vector<4x256xf32>
    %133 = arith.andi %16, %30 : vector<4x256xi1>
    %cst_58 = arith.constant 0.000000e+00 : f32
    %134 = vector.broadcast %cst_58 : f32 to vector<4x256xf32>
    %135 = arith.select %133, %132, %134 : vector<4x256xi1>, vector<4x256xf32>
    %c80 = arith.constant 80 : index
    %c0_59 = arith.constant 0 : index
    %136 = vector.load %arg6[%c80, %c0_59] : memref<256x256xf32, #tpu.memory_space<vmem>>, vector<4x256xf32>
    tpu.vector_store %arg6[%c80, %c0_59], %135 {strides = array<i32>} : memref<256x256xf32, #tpu.memory_space<vmem>>, vector<4x256xf32>,
    %c3_i32_60 = arith.constant 3 : i32
    %137 = tpu.dynamic_rotate %34 by %c3_i32_60 dim 1 : vector<4x256xf32>, i32 -> vector<4x256xf32>
    %cst_61 = arith.constant 0.000000e+00 : f32
    %138 = vector.broadcast %cst_61 : f32 to vector<4x256xf32>
    %139 = arith.select %10, %137, %138 : vector<4x256xi1>, vector<4x256xf32>
    %c84 = arith.constant 84 : index
    %c0_62 = arith.constant 0 : index
    %140 = vector.load %arg6[%c84, %c0_62] : memref<256x256xf32, #tpu.memory_space<vmem>>, vector<4x256xf32>
    tpu.vector_store %arg6[%c84, %c0_62], %139 {strides = array<i32>} : memref<256x256xf32, #tpu.memory_space<vmem>>, vector<4x256xf32>,
    %c2_i32_63 = arith.constant 2 : i32
    %141 = tpu.dynamic_rotate %34 by %c2_i32_63 dim 1 : vector<4x256xf32>, i32 -> vector<4x256xf32>
    %cst_64 = arith.constant 0.000000e+00 : f32
    %142 = vector.broadcast %cst_64 : f32 to vector<4x256xf32>
    %143 = arith.select %14, %141, %142 : vector<4x256xi1>, vector<4x256xf32>
    %c88 = arith.constant 88 : index
    %c0_65 = arith.constant 0 : index
    %144 = vector.load %arg6[%c88, %c0_65] : memref<256x256xf32, #tpu.memory_space<vmem>>, vector<4x256xf32>
    tpu.vector_store %arg6[%c88, %c0_65], %143 {strides = array<i32>} : memref<256x256xf32, #tpu.memory_space<vmem>>, vector<4x256xf32>,
    %c1_i32_66 = arith.constant 1 : i32
    %145 = tpu.dynamic_rotate %34 by %c1_i32_66 dim 1 : vector<4x256xf32>, i32 -> vector<4x256xf32>
    %cst_67 = arith.constant 0.000000e+00 : f32
    %146 = vector.broadcast %cst_67 : f32 to vector<4x256xf32>
    %147 = arith.select %18, %145, %146 : vector<4x256xi1>, vector<4x256xf32>
    %c92 = arith.constant 92 : index
    %c0_68 = arith.constant 0 : index
    %148 = vector.load %arg6[%c92, %c0_68] : memref<256x256xf32, #tpu.memory_space<vmem>>, vector<4x256xf32>
    tpu.vector_store %arg6[%c92, %c0_68], %147 {strides = array<i32>} : memref<256x256xf32, #tpu.memory_space<vmem>>, vector<4x256xf32>,
    %c96 = arith.constant 96 : index
    %c0_69 = arith.constant 0 : index
    %149 = vector.load %arg6[%c96, %c0_69] : memref<256x256xf32, #tpu.memory_space<vmem>>, vector<4x256xf32>
    tpu.vector_store %arg6[%c96, %c0_69], %34 {strides = array<i32>} : memref<256x256xf32, #tpu.memory_space<vmem>>, vector<4x256xf32>,
    %c255_i32 = arith.constant 255 : i32
    %150 = tpu.dynamic_rotate %34 by %c255_i32 dim 1 : vector<4x256xf32>, i32 -> vector<4x256xf32>
    %cst_70 = arith.constant 0.000000e+00 : f32
    %151 = vector.broadcast %cst_70 : f32 to vector<4x256xf32>
    %152 = arith.select %22, %150, %151 : vector<4x256xi1>, vector<4x256xf32>
    %c100 = arith.constant 100 : index
    %c0_71 = arith.constant 0 : index
    %153 = vector.load %arg6[%c100, %c0_71] : memref<256x256xf32, #tpu.memory_space<vmem>>, vector<4x256xf32>
    tpu.vector_store %arg6[%c100, %c0_71], %152 {strides = array<i32>} : memref<256x256xf32, #tpu.memory_space<vmem>>, vector<4x256xf32>,
    %c254_i32 = arith.constant 254 : i32
    %154 = tpu.dynamic_rotate %34 by %c254_i32 dim 1 : vector<4x256xf32>, i32 -> vector<4x256xf32>
    %cst_72 = arith.constant 0.000000e+00 : f32
    %155 = vector.broadcast %cst_72 : f32 to vector<4x256xf32>
    %156 = arith.select %26, %154, %155 : vector<4x256xi1>, vector<4x256xf32>
    %c104 = arith.constant 104 : index
    %c0_73 = arith.constant 0 : index
    %157 = vector.load %arg6[%c104, %c0_73] : memref<256x256xf32, #tpu.memory_space<vmem>>, vector<4x256xf32>
    tpu.vector_store %arg6[%c104, %c0_73], %156 {strides = array<i32>} : memref<256x256xf32, #tpu.memory_space<vmem>>, vector<4x256xf32>,
    %c253_i32 = arith.constant 253 : i32
    %158 = tpu.dynamic_rotate %34 by %c253_i32 dim 1 : vector<4x256xf32>, i32 -> vector<4x256xf32>
    %cst_74 = arith.constant 0.000000e+00 : f32
    %159 = vector.broadcast %cst_74 : f32 to vector<4x256xf32>
    %160 = arith.select %30, %158, %159 : vector<4x256xi1>, vector<4x256xf32>
    %c108 = arith.constant 108 : index
    %c0_75 = arith.constant 0 : index
    %161 = vector.load %arg6[%c108, %c0_75] : memref<256x256xf32, #tpu.memory_space<vmem>>, vector<4x256xf32>
    tpu.vector_store %arg6[%c108, %c0_75], %160 {strides = array<i32>} : memref<256x256xf32, #tpu.memory_space<vmem>>, vector<4x256xf32>,
    %c243_i32 = arith.constant 243 : i32
    %162 = tpu.dynamic_rotate %34 by %c243_i32 dim 1 : vector<4x256xf32>, i32 -> vector<4x256xf32>
    %163 = arith.andi %20, %10 : vector<4x256xi1>
    %cst_76 = arith.constant 0.000000e+00 : f32
    %164 = vector.broadcast %cst_76 : f32 to vector<4x256xf32>
    %165 = arith.select %163, %162, %164 : vector<4x256xi1>, vector<4x256xf32>
    %c112 = arith.constant 112 : index
    %c0_77 = arith.constant 0 : index
    %166 = vector.load %arg6[%c112, %c0_77] : memref<256x256xf32, #tpu.memory_space<vmem>>, vector<4x256xf32>
    tpu.vector_store %arg6[%c112, %c0_77], %165 {strides = array<i32>} : memref<256x256xf32, #tpu.memory_space<vmem>>, vector<4x256xf32>,
    %c242_i32 = arith.constant 242 : i32
    %167 = tpu.dynamic_rotate %34 by %c242_i32 dim 1 : vector<4x256xf32>, i32 -> vector<4x256xf32>
    %168 = arith.andi %20, %14 : vector<4x256xi1>
    %cst_78 = arith.constant 0.000000e+00 : f32
    %169 = vector.broadcast %cst_78 : f32 to vector<4x256xf32>
    %170 = arith.select %168, %167, %169 : vector<4x256xi1>, vector<4x256xf32>
    %c116 = arith.constant 116 : index
    %c0_79 = arith.constant 0 : index
    %171 = vector.load %arg6[%c116, %c0_79] : memref<256x256xf32, #tpu.memory_space<vmem>>, vector<4x256xf32>
    tpu.vector_store %arg6[%c116, %c0_79], %170 {strides = array<i32>} : memref<256x256xf32, #tpu.memory_space<vmem>>, vector<4x256xf32>,
    %c241_i32 = arith.constant 241 : i32
    %172 = tpu.dynamic_rotate %34 by %c241_i32 dim 1 : vector<4x256xf32>, i32 -> vector<4x256xf32>
    %173 = arith.andi %20, %18 : vector<4x256xi1>
    %cst_80 = arith.constant 0.000000e+00 : f32
    %174 = vector.broadcast %cst_80 : f32 to vector<4x256xf32>
    %175 = arith.select %173, %172, %174 : vector<4x256xi1>, vector<4x256xf32>
    %c120 = arith.constant 120 : index
    %c0_81 = arith.constant 0 : index
    %176 = vector.load %arg6[%c120, %c0_81] : memref<256x256xf32, #tpu.memory_space<vmem>>, vector<4x256xf32>
    tpu.vector_store %arg6[%c120, %c0_81], %175 {strides = array<i32>} : memref<256x256xf32, #tpu.memory_space<vmem>>, vector<4x256xf32>,
    %c240_i32 = arith.constant 240 : i32
    %177 = tpu.dynamic_rotate %34 by %c240_i32 dim 1 : vector<4x256xf32>, i32 -> vector<4x256xf32>
    %cst_82 = arith.constant 0.000000e+00 : f32
    %178 = vector.broadcast %cst_82 : f32 to vector<4x256xf32>
    %179 = arith.select %20, %177, %178 : vector<4x256xi1>, vector<4x256xf32>
    %c124 = arith.constant 124 : index
    %c0_83 = arith.constant 0 : index
    %180 = vector.load %arg6[%c124, %c0_83] : memref<256x256xf32, #tpu.memory_space<vmem>>, vector<4x256xf32>
    tpu.vector_store %arg6[%c124, %c0_83], %179 {strides = array<i32>} : memref<256x256xf32, #tpu.memory_space<vmem>>, vector<4x256xf32>,
    %c239_i32 = arith.constant 239 : i32
    %181 = tpu.dynamic_rotate %34 by %c239_i32 dim 1 : vector<4x256xf32>, i32 -> vector<4x256xf32>
    %182 = arith.andi %20, %22 : vector<4x256xi1>
    %cst_84 = arith.constant 0.000000e+00 : f32
    %183 = vector.broadcast %cst_84 : f32 to vector<4x256xf32>
    %184 = arith.select %182, %181, %183 : vector<4x256xi1>, vector<4x256xf32>
    %c128 = arith.constant 128 : index
    %c0_85 = arith.constant 0 : index
    %185 = vector.load %arg6[%c128, %c0_85] : memref<256x256xf32, #tpu.memory_space<vmem>>, vector<4x256xf32>
    tpu.vector_store %arg6[%c128, %c0_85], %184 {strides = array<i32>} : memref<256x256xf32, #tpu.memory_space<vmem>>, vector<4x256xf32>,
    %c238_i32 = arith.constant 238 : i32
    %186 = tpu.dynamic_rotate %34 by %c238_i32 dim 1 : vector<4x256xf32>, i32 -> vector<4x256xf32>
    %187 = arith.andi %20, %26 : vector<4x256xi1>
    %cst_86 = arith.constant 0.000000e+00 : f32
    %188 = vector.broadcast %cst_86 : f32 to vector<4x256xf32>
    %189 = arith.select %187, %186, %188 : vector<4x256xi1>, vector<4x256xf32>
    %c132 = arith.constant 132 : index
    %c0_87 = arith.constant 0 : index
    %190 = vector.load %arg6[%c132, %c0_87] : memref<256x256xf32, #tpu.memory_space<vmem>>, vector<4x256xf32>
    tpu.vector_store %arg6[%c132, %c0_87], %189 {strides = array<i32>} : memref<256x256xf32, #tpu.memory_space<vmem>>, vector<4x256xf32>,
    %c237_i32 = arith.constant 237 : i32
    %191 = tpu.dynamic_rotate %34 by %c237_i32 dim 1 : vector<4x256xf32>, i32 -> vector<4x256xf32>
    %192 = arith.andi %20, %30 : vector<4x256xi1>
    %cst_88 = arith.constant 0.000000e+00 : f32
    %193 = vector.broadcast %cst_88 : f32 to vector<4x256xf32>
    %194 = arith.select %192, %191, %193 : vector<4x256xi1>, vector<4x256xf32>
    %c136 = arith.constant 136 : index
    %c0_89 = arith.constant 0 : index
    %195 = vector.load %arg6[%c136, %c0_89] : memref<256x256xf32, #tpu.memory_space<vmem>>, vector<4x256xf32>
    tpu.vector_store %arg6[%c136, %c0_89], %194 {strides = array<i32>} : memref<256x256xf32, #tpu.memory_space<vmem>>, vector<4x256xf32>,
    %c227_i32 = arith.constant 227 : i32
    %196 = tpu.dynamic_rotate %34 by %c227_i32 dim 1 : vector<4x256xf32>, i32 -> vector<4x256xf32>
    %197 = arith.andi %24, %10 : vector<4x256xi1>
    %cst_90 = arith.constant 0.000000e+00 : f32
    %198 = vector.broadcast %cst_90 : f32 to vector<4x256xf32>
    %199 = arith.select %197, %196, %198 : vector<4x256xi1>, vector<4x256xf32>
    %c140 = arith.constant 140 : index
    %c0_91 = arith.constant 0 : index
    %200 = vector.load %arg6[%c140, %c0_91] : memref<256x256xf32, #tpu.memory_space<vmem>>, vector<4x256xf32>
    tpu.vector_store %arg6[%c140, %c0_91], %199 {strides = array<i32>} : memref<256x256xf32, #tpu.memory_space<vmem>>, vector<4x256xf32>,
    %c226_i32 = arith.constant 226 : i32
    %201 = tpu.dynamic_rotate %34 by %c226_i32 dim 1 : vector<4x256xf32>, i32 -> vector<4x256xf32>
    %202 = arith.andi %24, %14 : vector<4x256xi1>
    %cst_92 = arith.constant 0.000000e+00 : f32
    %203 = vector.broadcast %cst_92 : f32 to vector<4x256xf32>
    %204 = arith.select %202, %201, %203 : vector<4x256xi1>, vector<4x256xf32>
    %c144 = arith.constant 144 : index
    %c0_93 = arith.constant 0 : index
    %205 = vector.load %arg6[%c144, %c0_93] : memref<256x256xf32, #tpu.memory_space<vmem>>, vector<4x256xf32>
    tpu.vector_store %arg6[%c144, %c0_93], %204 {strides = array<i32>} : memref<256x256xf32, #tpu.memory_space<vmem>>, vector<4x256xf32>,
    %c225_i32 = arith.constant 225 : i32
    %206 = tpu.dynamic_rotate %34 by %c225_i32 dim 1 : vector<4x256xf32>, i32 -> vector<4x256xf32>
    %207 = arith.andi %24, %18 : vector<4x256xi1>
    %cst_94 = arith.constant 0.000000e+00 : f32
    %208 = vector.broadcast %cst_94 : f32 to vector<4x256xf32>
    %209 = arith.select %207, %206, %208 : vector<4x256xi1>, vector<4x256xf32>
    %c148 = arith.constant 148 : index
    %c0_95 = arith.constant 0 : index
    %210 = vector.load %arg6[%c148, %c0_95] : memref<256x256xf32, #tpu.memory_space<vmem>>, vector<4x256xf32>
    tpu.vector_store %arg6[%c148, %c0_95], %209 {strides = array<i32>} : memref<256x256xf32, #tpu.memory_space<vmem>>, vector<4x256xf32>,
    %c224_i32 = arith.constant 224 : i32
    %211 = tpu.dynamic_rotate %34 by %c224_i32 dim 1 : vector<4x256xf32>, i32 -> vector<4x256xf32>
    %cst_96 = arith.constant 0.000000e+00 : f32
    %212 = vector.broadcast %cst_96 : f32 to vector<4x256xf32>
    %213 = arith.select %24, %211, %212 : vector<4x256xi1>, vector<4x256xf32>
    %c152 = arith.constant 152 : index
    %c0_97 = arith.constant 0 : index
    %214 = vector.load %arg6[%c152, %c0_97] : memref<256x256xf32, #tpu.memory_space<vmem>>, vector<4x256xf32>
    tpu.vector_store %arg6[%c152, %c0_97], %213 {strides = array<i32>} : memref<256x256xf32, #tpu.memory_space<vmem>>, vector<4x256xf32>,
    %c223_i32 = arith.constant 223 : i32
    %215 = tpu.dynamic_rotate %34 by %c223_i32 dim 1 : vector<4x256xf32>, i32 -> vector<4x256xf32>
    %216 = arith.andi %24, %22 : vector<4x256xi1>
    %cst_98 = arith.constant 0.000000e+00 : f32
    %217 = vector.broadcast %cst_98 : f32 to vector<4x256xf32>
    %218 = arith.select %216, %215, %217 : vector<4x256xi1>, vector<4x256xf32>
    %c156 = arith.constant 156 : index
    %c0_99 = arith.constant 0 : index
    %219 = vector.load %arg6[%c156, %c0_99] : memref<256x256xf32, #tpu.memory_space<vmem>>, vector<4x256xf32>
    tpu.vector_store %arg6[%c156, %c0_99], %218 {strides = array<i32>} : memref<256x256xf32, #tpu.memory_space<vmem>>, vector<4x256xf32>,
    %c222_i32 = arith.constant 222 : i32
    %220 = tpu.dynamic_rotate %34 by %c222_i32 dim 1 : vector<4x256xf32>, i32 -> vector<4x256xf32>
    %221 = arith.andi %24, %26 : vector<4x256xi1>
    %cst_100 = arith.constant 0.000000e+00 : f32
    %222 = vector.broadcast %cst_100 : f32 to vector<4x256xf32>
    %223 = arith.select %221, %220, %222 : vector<4x256xi1>, vector<4x256xf32>
    %c160 = arith.constant 160 : index
    %c0_101 = arith.constant 0 : index
    %224 = vector.load %arg6[%c160, %c0_101] : memref<256x256xf32, #tpu.memory_space<vmem>>, vector<4x256xf32>
    tpu.vector_store %arg6[%c160, %c0_101], %223 {strides = array<i32>} : memref<256x256xf32, #tpu.memory_space<vmem>>, vector<4x256xf32>,
    %c221_i32 = arith.constant 221 : i32
    %225 = tpu.dynamic_rotate %34 by %c221_i32 dim 1 : vector<4x256xf32>, i32 -> vector<4x256xf32>
    %226 = arith.andi %24, %30 : vector<4x256xi1>
    %cst_102 = arith.constant 0.000000e+00 : f32
    %227 = vector.broadcast %cst_102 : f32 to vector<4x256xf32>
    %228 = arith.select %226, %225, %227 : vector<4x256xi1>, vector<4x256xf32>
    %c164 = arith.constant 164 : index
    %c0_103 = arith.constant 0 : index
    %229 = vector.load %arg6[%c164, %c0_103] : memref<256x256xf32, #tpu.memory_space<vmem>>, vector<4x256xf32>
    tpu.vector_store %arg6[%c164, %c0_103], %228 {strides = array<i32>} : memref<256x256xf32, #tpu.memory_space<vmem>>, vector<4x256xf32>,
    %c211_i32 = arith.constant 211 : i32
    %230 = tpu.dynamic_rotate %34 by %c211_i32 dim 1 : vector<4x256xf32>, i32 -> vector<4x256xf32>
    %231 = arith.andi %28, %10 : vector<4x256xi1>
    %cst_104 = arith.constant 0.000000e+00 : f32
    %232 = vector.broadcast %cst_104 : f32 to vector<4x256xf32>
    %233 = arith.select %231, %230, %232 : vector<4x256xi1>, vector<4x256xf32>
    %c168 = arith.constant 168 : index
    %c0_105 = arith.constant 0 : index
    %234 = vector.load %arg6[%c168, %c0_105] : memref<256x256xf32, #tpu.memory_space<vmem>>, vector<4x256xf32>
    tpu.vector_store %arg6[%c168, %c0_105], %233 {strides = array<i32>} : memref<256x256xf32, #tpu.memory_space<vmem>>, vector<4x256xf32>,
    %c210_i32 = arith.constant 210 : i32
    %235 = tpu.dynamic_rotate %34 by %c210_i32 dim 1 : vector<4x256xf32>, i32 -> vector<4x256xf32>
    %236 = arith.andi %28, %14 : vector<4x256xi1>
    %cst_106 = arith.constant 0.000000e+00 : f32
    %237 = vector.broadcast %cst_106 : f32 to vector<4x256xf32>
    %238 = arith.select %236, %235, %237 : vector<4x256xi1>, vector<4x256xf32>
    %c172 = arith.constant 172 : index
    %c0_107 = arith.constant 0 : index
    %239 = vector.load %arg6[%c172, %c0_107] : memref<256x256xf32, #tpu.memory_space<vmem>>, vector<4x256xf32>
    tpu.vector_store %arg6[%c172, %c0_107], %238 {strides = array<i32>} : memref<256x256xf32, #tpu.memory_space<vmem>>, vector<4x256xf32>,
    %c209_i32 = arith.constant 209 : i32
    %240 = tpu.dynamic_rotate %34 by %c209_i32 dim 1 : vector<4x256xf32>, i32 -> vector<4x256xf32>
    %241 = arith.andi %28, %18 : vector<4x256xi1>
    %cst_108 = arith.constant 0.000000e+00 : f32
    %242 = vector.broadcast %cst_108 : f32 to vector<4x256xf32>
    %243 = arith.select %241, %240, %242 : vector<4x256xi1>, vector<4x256xf32>
    %c176 = arith.constant 176 : index
    %c0_109 = arith.constant 0 : index
    %244 = vector.load %arg6[%c176, %c0_109] : memref<256x256xf32, #tpu.memory_space<vmem>>, vector<4x256xf32>
    tpu.vector_store %arg6[%c176, %c0_109], %243 {strides = array<i32>} : memref<256x256xf32, #tpu.memory_space<vmem>>, vector<4x256xf32>,
    %c208_i32 = arith.constant 208 : i32
    %245 = tpu.dynamic_rotate %34 by %c208_i32 dim 1 : vector<4x256xf32>, i32 -> vector<4x256xf32>
    %cst_110 = arith.constant 0.000000e+00 : f32
    %246 = vector.broadcast %cst_110 : f32 to vector<4x256xf32>
    %247 = arith.select %28, %245, %246 : vector<4x256xi1>, vector<4x256xf32>
    %c180 = arith.constant 180 : index
    %c0_111 = arith.constant 0 : index
    %248 = vector.load %arg6[%c180, %c0_111] : memref<256x256xf32, #tpu.memory_space<vmem>>, vector<4x256xf32>
    tpu.vector_store %arg6[%c180, %c0_111], %247 {strides = array<i32>} : memref<256x256xf32, #tpu.memory_space<vmem>>, vector<4x256xf32>,
    %c207_i32 = arith.constant 207 : i32
    %249 = tpu.dynamic_rotate %34 by %c207_i32 dim 1 : vector<4x256xf32>, i32 -> vector<4x256xf32>
    %250 = arith.andi %28, %22 : vector<4x256xi1>
    %cst_112 = arith.constant 0.000000e+00 : f32
    %251 = vector.broadcast %cst_112 : f32 to vector<4x256xf32>
    %252 = arith.select %250, %249, %251 : vector<4x256xi1>, vector<4x256xf32>
    %c184 = arith.constant 184 : index
    %c0_113 = arith.constant 0 : index
    %253 = vector.load %arg6[%c184, %c0_113] : memref<256x256xf32, #tpu.memory_space<vmem>>, vector<4x256xf32>
    tpu.vector_store %arg6[%c184, %c0_113], %252 {strides = array<i32>} : memref<256x256xf32, #tpu.memory_space<vmem>>, vector<4x256xf32>,
    %c206_i32 = arith.constant 206 : i32
    %254 = tpu.dynamic_rotate %34 by %c206_i32 dim 1 : vector<4x256xf32>, i32 -> vector<4x256xf32>
    %255 = arith.andi %28, %26 : vector<4x256xi1>
    %cst_114 = arith.constant 0.000000e+00 : f32
    %256 = vector.broadcast %cst_114 : f32 to vector<4x256xf32>
    %257 = arith.select %255, %254, %256 : vector<4x256xi1>, vector<4x256xf32>
    %c188 = arith.constant 188 : index
    %c0_115 = arith.constant 0 : index
    %258 = vector.load %arg6[%c188, %c0_115] : memref<256x256xf32, #tpu.memory_space<vmem>>, vector<4x256xf32>
    tpu.vector_store %arg6[%c188, %c0_115], %257 {strides = array<i32>} : memref<256x256xf32, #tpu.memory_space<vmem>>, vector<4x256xf32>,
    %c205_i32 = arith.constant 205 : i32
    %259 = tpu.dynamic_rotate %34 by %c205_i32 dim 1 : vector<4x256xf32>, i32 -> vector<4x256xf32>
    %260 = arith.andi %28, %30 : vector<4x256xi1>
    %cst_116 = arith.constant 0.000000e+00 : f32
    %261 = vector.broadcast %cst_116 : f32 to vector<4x256xf32>
    %262 = arith.select %260, %259, %261 : vector<4x256xi1>, vector<4x256xf32>
    %c192 = arith.constant 192 : index
    %c0_117 = arith.constant 0 : index
    %263 = vector.load %arg6[%c192, %c0_117] : memref<256x256xf32, #tpu.memory_space<vmem>>, vector<4x256xf32>
    tpu.vector_store %arg6[%c192, %c0_117], %262 {strides = array<i32>} : memref<256x256xf32, #tpu.memory_space<vmem>>, vector<4x256xf32>,
    %c0_118 = arith.constant 0 : index
    %c0_119 = arith.constant 0 : index
    %264 = vector.load %arg2[%c0_118, %c0_119] : memref<16x256xf32, #tpu.memory_space<vmem>>, vector<16x256xf32>
    %c0_120 = arith.constant 0 : index
    %c0_121 = arith.constant 0 : index
    %265 = vector.load %arg6[%c0_120, %c0_121] : memref<256x256xf32, #tpu.memory_space<vmem>>, vector<256x256xf32>
    %cst_122 = arith.constant dense<0.000000e+00> : vector<16x256xf32>
    %266 = tpu.matmul %264, %265, %cst_122 {dimension_numbers = #tpu.dot_dimension_numbers<[1], [0], [0], [1], [0, 0, 1, 1], [], []>} : vector<16x256xf32>, vector<256x256xf32>, vector<16x256xf32> -> vector<16x256xf32>
    %267 = vector.broadcast %31 : vector<16x1xf32> to vector<16x256xf32>
    %268 = arith.mulf %266, %267 : vector<16x256xf32>
    %269 = vector.broadcast %32 : vector<16x1xf32> to vector<16x256xf32>
    %270 = arith.addf %268, %269 : vector<16x256xf32>
    %cst_123 = arith.constant 0.000000e+00 : f32
    %271 = vector.broadcast %cst_123 : f32 to vector<16x256xf32>
    %272 = arith.maximumf %270, %271 : vector<16x256xf32>
    %273 = vector.extract_strided_slice %272 {offsets = [0, 0], sizes = [12, 256], strides = [1, 1]} : vector<16x256xf32> to vector<12x256xf32>
    %c0_124 = arith.constant 0 : index
    %c0_125 = arith.constant 0 : index
    %c0_126 = arith.constant 0 : index
    %274 = vector.load %arg5[%c0_124, %c0_125, %c0_126] : memref<1x12x256xf32, #tpu.memory_space<vmem>>, vector<1x12x256xf32>
    %275 = vector.shape_cast %274 : vector<1x12x256xf32> to vector<12x256xf32>
    %276 = vector.shape_cast %273 : vector<12x256xf32> to vector<1x12x256xf32>
    tpu.vector_store %arg5[%c0_124, %c0_125, %c0_126], %276 {strides = array<i32>} : memref<1x12x256xf32, #tpu.memory_space<vmem>>, vector<1x12x256xf32>,
    return
  }
  func.func @transform_0(%arg0: i32) -> (i32, i32, i32) {
    %c0_i32 = arith.constant 0 : i32
    %c0_i32_0 = arith.constant 0 : i32
    %c0_i32_1 = arith.constant 0 : i32
    return %arg0, %c0_i32, %c0_i32_0 : i32, i32, i32
  }
  func.func @transform_1(%arg0: i32) -> (i32, i32) {
    %c0_i32 = arith.constant 0 : i32
    %c0_i32_0 = arith.constant 0 : i32
    %c0_i32_1 = arith.constant 0 : i32
    return %c0_i32, %c0_i32_0 : i32, i32
  }
  func.func @transform_2(%arg0: i32) -> (i32, i32) {
    %c0_i32 = arith.constant 0 : i32
    %c0_i32_0 = arith.constant 0 : i32
    %c0_i32_1 = arith.constant 0 : i32
    return %c0_i32, %c0_i32_0 : i32, i32
  }
  func.func @transform_3(%arg0: i32) -> (i32, i32) {
    %c0_i32 = arith.constant 0 : i32
    %c0_i32_0 = arith.constant 0 : i32
    %c0_i32_1 = arith.constant 0 : i32
    return %c0_i32, %c0_i32_0 : i32, i32
  }
  func.func @transform_4(%arg0: i32) -> (i32, i32, i32) {
    %c0_i32 = arith.constant 0 : i32
    %c0_i32_0 = arith.constant 0 : i32
    %c0_i32_1 = arith.constant 0 : i32
    return %arg0, %c0_i32, %c0_i32_0 : i32, i32, i32
  }
}

</mosaic_0001>

<bundles_post_ra>
// kernel: multiscale_layer.1
= control target key start
LH: loop header
LB: loop body
LE: loop exit
PB: predicated region body
PF: predicated region fallthrough
CT: control target
= control target key end

     0   :  { %s1489_s15 = smov 0   ;;  %s2367_s0 = inlined_call_operand.vmem [shape: f32[2,4,256], index: 0, kind: input, shape index: {}]   ;;  %s2368_s1 = inlined_call_operand.vmem [shape: f32[16,256], index: 1, kind: input, shape index: {}]   ;;  %s2369_s2 = inlined_call_operand.vmem [shape: f32[16,1], index: 2, kind: input, shape index: {}]   ;;  %s2370_s3 = inlined_call_operand.vmem [shape: f32[16,1], index: 3, kind: input, shape index: {}]   ;;  %s2371_s4 = inlined_call_operand.vmem [shape: f32[2,12,256], index: 4, kind: output, shape index: {}]  }
   0x1 LB: > { %s1235_s16 = sadd.s32 4294967295, %s1411_s15   ;;  %p1239_p0 = scmp.ge.s32.totalorder %s1411_s15, 1  ;;  %s1411_s15 = sphi %s1489_s15, %s14_s15  }
   0x2   : > { %p162_p1 = scmp.lt.s32.totalorder %s1411_s15, 3 }
   0x4   : > { %p163_p2 = pnand %p1239_p0, %p162_p1 }
   0x5   : > { %p188_p3 = scmp.lt.s32.totalorder (!%p163_p2), %s1235_s16, 1  ;;  %s1413_s21 = smov (!%p163_p2), 48   ;;  %v214_v2 = vlaneseq (!%p163_p2)  ;;  %v1458_v51 = vmov (!%p163_p2), 0.0  }
   0x6   : > { %166 = sbr.rel (%p163_p2) target bundleno = 568 (0x238), region = 36  ;;  %s1414_s22 = smov (!%p163_p2), 50   ;;  %199 = vst [vmem:[#allocation2 + $0x188] sm:$0xf0] (!%p163_p2), %v1458_v51  ;;  %198 = vst [vmem:[#allocation2 + $0x180] sm:$0xf0] (!%p163_p2), %v1458_v51 }
   0x7   : > { %s1415_s23 = smov (!%p163_p2), 51   ;;  %s1416_s24 = smov (!%p163_p2), 49   ;;  %v1565_v3 = vand.u32 (!%p163_p2), 127, %v214_v2 }
   0x8   : > { %s1417_s25 = smov (!%p163_p2), 46   ;;  %s1418_s26 = smov (!%p163_p2), 35  }
   0x9   : > { %s1419_s27 = smov (!%p163_p2), 47   ;;  %s1420_s28 = smov (!%p163_p2), 45   ;;  %v216_v4 = vadd.s32 (!%p163_p2), 128, %v1565_v3  ;;  %v1571_v5 = vand.u32 (!%p163_p2), 15, %v1565_v3  ;;  %v1578_v7 = vshra.s32 (!%p163_p2), %v1565_v3, 4  ;;  %vm302_vm1 = vcmp.lt.s32.totalorder (!%p163_p2), %v1565_v3, 48 }
   0xa   : > { %s1421_s29 = smov (!%p163_p2), 33   ;;  %s1422_s30 = smov (!%p163_p2), 31   ;;  %vm257_vm9 = vcmp.lt.s32.totalorder (!%p163_p2), %v1565_v3, 51  ;;  %vm270_vm10 = vcmp.lt.s32.totalorder (!%p163_p2), %v1565_v3, 50  ;;  %vm289_vm15 = vcmp.lt.s32.totalorder (!%p163_p2), %v1565_v3, 49 }
   0xb   : > { %s1423_s5 = smov (!%p163_p2), 34   ;;  %s1424_s6 = smov (!%p163_p2), 32   ;;  %v1575_v6 = vand.u32 (!%p163_p2), 15, %v216_v4  ;;  %v1580_v8 = vshra.s32 (!%p163_p2), %v216_v4, 4  ;;  %vm2373_vm0 = vcmp.ge.s32.totalorder (!%p163_p2), %v1571_v5, 3  ;;  %vm221_vm3 = vcmp.ge.s32.totalorder (!%p163_p2), %v1578_v7, 3 }
   0xc   : > { %s1425_s7 = smov (!%p163_p2), 29   ;;  %s1426_s8 = smov (!%p163_p2), 18   ;;  %vm2378_vm5 = vcmp.ge.s32.totalorder (!%p163_p2), %v1571_v5, 2  ;;  %vm1594_vm6 = vmand (!%p163_p2), %vm221_vm3, %vm2373_vm0  ;;  %vm231_vm13 = vcmp.ge.s32.totalorder (!%p163_p2), %v1571_v5, 1 }
   0xd   : > { %s2510_s16 = smov (!%p188_p3, %s1235_s16), 1  ;;  %s1427_s9 = smov 30   ;;  %vm2375_vm2 = vcmp.ge.s32.totalorder %v1575_v6, 3  ;;  %vm222_vm4 = vcmp.ge.s32.totalorder %v1580_v8, 3  ;;  %vm2377_vm7 = vcmp.ge.s32.totalorder %v1575_v6, 2  ;;  %vm1619_vm11 = vmand %vm221_vm3, %vm2378_vm5  ;;  %vm2379_vm14 = vcmp.ge.s32.totalorder %v1575_v6, 1 }
   0xe   : > { %s1246_s17 = sshll.u32 %s2510_s16, 3  ;;  %s1428_s10 = smov 19   ;;  %vm1603_vm8 = vmand %vm222_vm4, %vm2375_vm2 }
   0xf   : > { %s192_s20 = scalar_lea.vmem %s2367_s0, %s1246_s17  ;;  %s1429_s11 = smov 16   ;;  %vm1627_vm12 = vmand %vm222_vm4, %vm2377_vm7 }
  0x10   : > { %v1503_v0 = vld [vmem:[%s192_s20] sm:$0xff]  ;;  %s1430_s12 = smov 14   ;;  %s1431_s13 = smov 17  }
  0x11   : > { %298 = vrot.lane.b32.xlu1 %v1503_v0, %s1413_s21  ;;  %625 = vst [vmem:[#allocation2 + $0xc0] sm:$0xf] %v1503_v0  ;;  %266 = vrot.lane.b32.xlu0 %v1503_v0, %s1414_s22  ;;  %v1510_v1 = vcombine.high %v1503_v0, %v1503_v0  ;;  %s1432_s14 = smov 15   ;;  %s1433_s17 = smov 3  }
  0x12   : > { %s1434_s18 = smov 1   ;;  %s1435_s19 = smov 13  }
  0x13   : > { %626 = vst [vmem:[#allocation2 + $0xc8] sm:$0xf] %v1510_v1  ;;  %s1436_s20 = smov 2  }
  0x15   : > { %253 = vrot.lane.b32.xlu0 %v1503_v0, %s1415_s23  ;;  %300 = vrot.lane.b32.xlu1 %v1510_v1, %s1413_s21  ;;  %s1437_s21 = smov 127  }
  0x19   : > { %255 = vrot.lane.b32.xlu1 %v1510_v1, %s1415_s23  ;;  %268 = vrot.lane.b32.xlu0 %v1510_v1, %s1414_s22  ;;  %s1438_s22 = smov 125   ;;  %s1439_s23 = smov 126  }
  0x1d   : > { %287 = vrot.lane.b32.xlu1 %v1510_v1, %s1416_s24  ;;  %285 = vrot.lane.b32.xlu0 %v1503_v0, %s1416_s24  ;;  %s1440_s24 = smov 114  }
  0x21   : > { %330 = vrot.lane.b32.xlu1 %v1510_v1, %s1417_s25  ;;  %328 = vrot.lane.b32.xlu0 %v1503_v0, %s1417_s25  ;;  %s1441_s25 = smov 112  }
  0x25   : > { %362 = vrot.lane.b32.xlu1 %v1510_v1, %s1418_s26  ;;  %360 = vrot.lane.b32.xlu0 %v1503_v0, %s1418_s26  ;;  %s1442_s26 = smov 115  }
  0x29   : > { %317 = vrot.lane.b32.xlu1 %v1510_v1, %s1419_s27  ;;  %315 = vrot.lane.b32.xlu0 %v1503_v0, %s1419_s27  ;;  %s1443_s27 = smov 113  }
  0x2d   : > { %349 = vrot.lane.b32.xlu1 %v1510_v1, %s1420_s28  ;;  %347 = vrot.lane.b32.xlu0 %v1503_v0, %s1420_s28  ;;  %s1444_s28 = smov 110  }
  0x31   : > { %394 = vrot.lane.b32.xlu1 %v1510_v1, %s1421_s29  ;;  %392 = vrot.lane.b32.xlu0 %v1503_v0, %s1421_s29  ;;  %s1445_s29 = smov 99  }
  0x35   : > { %424 = vrot.lane.b32.xlu1 %v1510_v1, %s1422_s30  ;;  %422 = vrot.lane.b32.xlu0 %v1503_v0, %s1422_s30  ;;  %s1446_s30 = smov 111  }
  0x39   : > { %381 = vrot.lane.b32.xlu1 %v1510_v1, %s1423_s5  ;;  %379 = vrot.lane.b32.xlu0 %v1503_v0, %s1423_s5  ;;  %s1447_s5 = smov 109  }
  0x3d   : > { %413 = vrot.lane.b32.xlu1 %v1510_v1, %s1424_s6  ;;  %411 = vrot.lane.b32.xlu0 %v1503_v0, %s1424_s6  ;;  %s1448_s6 = smov 97  }
  0x41   : > { %456 = vrot.lane.b32.xlu1 %v1510_v1, %s1425_s7  ;;  %454 = vrot.lane.b32.xlu0 %v1503_v0, %s1425_s7  ;;  %s1449_s7 = smov 95  }
  0x45   : > { %488 = vrot.lane.b32.xlu1 %v1510_v1, %s1426_s8  ;;  %486 = vrot.lane.b32.xlu0 %v1503_v0, %s1426_s8  ;;  %s1450_s8 = smov 98  }
  0x49   : > { %443 = vrot.lane.b32.xlu1 %v1510_v1, %s1427_s9  ;;  %441 = vrot.lane.b32.xlu0 %v1503_v0, %s1427_s9  ;;  %s1451_s9 = smov 96  }
  0x4d   : > { %475 = vrot.lane.b32.xlu1 %v1510_v1, %s1428_s10  ;;  %473 = vrot.lane.b32.xlu0 %v1503_v0, %s1428_s10  ;;  %s1452_s10 = smov 93  }
  0x51   : > { %520 = vrot.lane.b32.xlu1 %v1510_v1, %s1429_s11  ;;  %518 = vrot.lane.b32.xlu0 %v1503_v0, %s1429_s11  ;;  %s1453_s11 = smov 82  }
  0x55   : > { %550 = vrot.lane.b32.xlu1 %v1510_v1, %s1430_s12  ;;  %548 = vrot.lane.b32.xlu0 %v1503_v0, %s1430_s12  ;;  %s1454_s12 = smov 94  }
  0x59   : > { %507 = vrot.lane.b32.xlu1 %v1510_v1, %s1431_s13  ;;  %505 = vrot.lane.b32.xlu0 %v1503_v0, %s1431_s13  ;;  %s1455_s13 = smov 83  }
  0x5d   : > { %537 = vrot.lane.b32.xlu1 %v1510_v1, %s1432_s14  ;;  %535 = vrot.lane.b32.xlu0 %v1503_v0, %s1432_s14  ;;  %s1456_s14 = smov 80  }
  0x61   : > { %582 = vrot.lane.b32.xlu1 %v1510_v1, %s1433_s17  ;;  %580 = vrot.lane.b32.xlu0 %v1503_v0, %s1433_s17  ;;  %s1457_s17 = smov 78  }
  0x65   : > { %610 = vrot.lane.b32.xlu1 %v1510_v1, %s1434_s18  ;;  %608 = vrot.lane.b32.xlu0 %v1503_v0, %s1434_s18  ;;  %s1459_s18 = smov 81  }
  0x69   : > { %569 = vrot.lane.b32.xlu1 %v1510_v1, %s1435_s19  ;;  %567 = vrot.lane.b32.xlu0 %v1503_v0, %s1435_s19  ;;  %s1460_s19 = smov 79  }
  0x6d   : > { %599 = vrot.lane.b32.xlu1 %v1510_v1, %s1436_s20  ;;  %597 = vrot.lane.b32.xlu0 %v1503_v0, %s1436_s20  ;;  %s1461_s20 = smov 77  }
  0x71   : > { %629 = vrot.lane.b32.xlu1 %v1510_v1, %s1437_s21  ;;  %627 = vrot.lane.b32.xlu0 %v1503_v0, %s1437_s21 }
  0x75   : > { %657 = vrot.lane.b32.xlu1 %v1510_v1, %s1438_s22  ;;  %655 = vrot.lane.b32.xlu0 %v1503_v0, %s1438_s22 }
  0x79   : > { %646 = vrot.lane.b32.xlu1 %v1510_v1, %s1439_s23  ;;  %644 = vrot.lane.b32.xlu0 %v1503_v0, %s1439_s23 }
  0x7d   : > { %687 = vrot.lane.b32.xlu1 %v1510_v1, %s1440_s24  ;;  %685 = vrot.lane.b32.xlu0 %v1503_v0, %s1440_s24 }
  0x81   : > { %719 = vrot.lane.b32.xlu1 %v1510_v1, %s1441_s25  ;;  %717 = vrot.lane.b32.xlu0 %v1503_v0, %s1441_s25 }
  0x83   : > { %v299_v9 = vpop.permute.xlu1 %298  ;;  %v267_v10 = vpop.permute.xlu0 %266 }
  0x85   : > { %674 = vrot.lane.b32.xlu1 %v1510_v1, %s1442_s26  ;;  %672 = vrot.lane.b32.xlu0 %v1503_v0, %s1442_s26 }
  0x87   : > { %v254_v11 = vpop.permute.xlu0 %253  ;;  %v301_v12 = vpop.permute.xlu1 %300 }
  0x88   : > { %v303_v14 = vsel %vm302_vm1, %v299_v9, %v301_v12  ;;  %v304_v15 = vsel %vm302_vm1, %v301_v12, %v299_v9  ;;  %vm1648_vm1 = vmand %vm221_vm3, %vm231_vm13 }
  0x89   : > { %v305_v17 = vsel %vm221_vm3, %v304_v15, 0.0  ;;  %v306_v18 = vsel %vm222_vm4, %v303_v14, 0.0  ;;  %706 = vrot.lane.b32.xlu1 %v1510_v1, %s1443_s27  ;;  %704 = vrot.lane.b32.xlu0 %v1503_v0, %s1443_s27 }
  0x8a   : > { %v309_v20 = vrot.slane %v305_v17, 4  ;;  %v310_v21 = vrot.slane %v306_v18, 4 }
  0x8b   : > { %v256_v23 = vpop.permute.xlu1 %255  ;;  %v269_v24 = vpop.permute.xlu0 %268 }
  0x8c   : > { %313 = vst [vmem:[#allocation2 + $0x10] sm:$0xf0] %v309_v20  ;;  %314 = vst [vmem:[#allocation2 + $0x18] sm:$0xf0] %v310_v21  ;;  %v258_v25 = vsel %vm257_vm9, %v254_v11, %v256_v23  ;;  %v259_v26 = vsel %vm257_vm9, %v256_v23, %v254_v11  ;;  %v271_v27 = vsel %vm270_vm10, %v267_v10, %v269_v24  ;;  %vm2372_vm9 = vcmp.lt.s32.totalorder %v1575_v6, 14 }
  0x8d   : > { %v272_v28 = vsel %vm270_vm10, %v269_v24, %v267_v10  ;;  %v262_v29 = vsel %vm1594_vm6, %v259_v26, 0.0  ;;  %v263_v30 = vsel %vm1603_vm8, %v258_v25, 0.0  ;;  %v276_v32 = vsel %vm1627_vm12, %v271_v27, 0.0  ;;  %749 = vrot.lane.b32.xlu1 %v1510_v1, %s1444_s28  ;;  %747 = vrot.lane.b32.xlu0 %v1503_v0, %s1444_s28  ;;  %vm1656_vm6 = vmand %vm222_vm4, %vm2379_vm14 }
  0x8e   : > { %v275_v31 = vsel %vm1619_vm11, %v272_v28, 0.0  ;;  %264 = vst [vmem:[#allocation2] sm:$0xf] %v262_v29  ;;  %265 = vst [vmem:[#allocation2 + $0x8] sm:$0xf] %v263_v30  ;;  %v280_v35 = vrot.slane %v276_v32, 4 }
  0x8f   : > { %v279_v34 = vrot.slane %v275_v31, 4  ;;  %vm2374_vm8 = vcmp.lt.s32.totalorder %v1571_v5, 14  ;;  %v288_v37 = vpop.permute.xlu1 %287  ;;  %v286_v38 = vpop.permute.xlu0 %285  ;;  %vm332_vm10 = vcmp.lt.s32.totalorder %v1565_v3, 46  ;;  %vm1685_vm12 = vmand %vm222_vm4, %vm2372_vm9 }
  0x90   : > { %284 = vst [vmem:[#allocation2 + $0x8] sm:$0xf0] %v280_v35  ;;  %v290_v39 = vsel %vm289_vm15, %v286_v38, %v288_v37  ;;  %v291_v40 = vsel %vm289_vm15, %v288_v37, %v286_v38  ;;  %vm1677_vm11 = vmand %vm221_vm3, %vm2374_vm8  ;;  %vm225_vm15 = vcmp.ge.s32.totalorder %v1578_v7, 2 }
  0x91   : > { %283 = vst [vmem:[#allocation2] sm:$0xf0] %v279_v34  ;;  %v294_v41 = vsel %vm1648_vm1, %v291_v40, 0.0  ;;  %v295_v42 = vsel %vm1656_vm6, %v290_v39, 0.0  ;;  %781 = vrot.lane.b32.xlu1 %v1510_v1, %s1445_s29  ;;  %779 = vrot.lane.b32.xlu0 %v1503_v0, %s1445_s29  ;;  %vm226_vm1 = vcmp.ge.s32.totalorder %v1580_v8, 2  ;;  %vm364_vm6 = vcmp.lt.s32.totalorder %v1565_v3, 35  ;;  %vm1702_vm9 = vmand %vm225_vm15, %vm2373_vm0 }
  0x92   : > { %296 = vst [vmem:[#allocation2 + $0x10] sm:$0xf] %v294_v41  ;;  %297 = vst [vmem:[#allocation2 + $0x18] sm:$0xf] %v295_v42  ;;  %vm319_vm0 = vcmp.lt.s32.totalorder %v1565_v3, 47 }
  0x93   : > { %v331_v45 = vpop.permute.xlu1 %330  ;;  %v329_v46 = vpop.permute.xlu0 %328 }
  0x94   : > { %v333_v47 = vsel %vm332_vm10, %v329_v46, %v331_v45  ;;  %v334_v48 = vsel %vm332_vm10, %v331_v45, %v329_v46  ;;  %vm235_vm10 = vcmp.lt.s32.totalorder %v1571_v5, 15 }
  0x95   : > { %v337_v49 = vsel %vm1677_vm11, %v334_v48, 0.0  ;;  %v338_v50 = vsel %vm1685_vm12, %v333_v47, 0.0  ;;  %736 = vrot.lane.b32.xlu1 %v1510_v1, %s1446_s30  ;;  %734 = vrot.lane.b32.xlu0 %v1503_v0, %s1446_s30  ;;  %vm1711_vm11 = vmand %vm226_vm1, %vm2375_vm2  ;;  %vm236_vm12 = vcmp.lt.s32.totalorder %v1575_v6, 15  ;;  %vm351_vm2 = vcmp.lt.s32.totalorder %v1565_v3, 45 }
  0x96   : > { %v341_v52 = vrot.slane %v337_v49, 4  ;;  %v342_v53 = vrot.slane %v338_v50, 4  ;;  %vm1721_vm8 = vmand %vm221_vm3, %vm235_vm10 }
  0x97   : > { %v363_v55 = vpop.permute.xlu1 %362  ;;  %v361_v56 = vpop.permute.xlu0 %360  ;;  %v1004_v60 = vld [vmem:[#allocation2 + $0x8] sm:$0xff] }
  0x98   : > { %345 = vst [vmem:[#allocation2 + $0x20] sm:$0xf0] %v341_v52  ;;  %346 = vst [vmem:[#allocation2 + $0x28] sm:$0xf0] %v342_v53  ;;  %v365_v57 = vsel %vm364_vm6, %v361_v56, %v363_v55  ;;  %v366_v58 = vsel %vm364_vm6, %v363_v55, %v361_v56  ;;  %v1003_v2 = vld [vmem:[#allocation2] sm:$0xff]  ;;  %vm243_vm6 = vcmp.lt.s32.totalorder %v1571_v5, 13 }
  0x99   : > { %v369_v61 = vsel %vm1702_vm9, %v366_v58, 0.0  ;;  %v370_v62 = vsel %vm1711_vm11, %v365_v57, 0.0  ;;  %768 = vrot.lane.b32.xlu1 %v1510_v1, %s1447_s5  ;;  %766 = vrot.lane.b32.xlu0 %v1503_v0, %s1447_s5  ;;  %v1006_v63 = vld [vmem:[#allocation2 + $0x18] sm:$0xff]  ;;  %v1005_v4 = vld [vmem:[#allocation2 + $0x10] sm:$0xff]  ;;  %vm1736_vm9 = vmand %vm222_vm4, %vm236_vm12  ;;  %vm2376_vm11 = vcmp.lt.s32.totalorder %v1575_v6, 13 }
  0x9a   : > { %v373_v9 = vrot.slane %v369_v61, 4  ;;  %v374_v10 = vrot.slane %v370_v62, 4  ;;  %v1248_v12 = vpack.c.bf16 %v1006_v63, %v1004_v60  ;;  %v1250_v13 = vpack.c.bf16 %v1005_v4, %v1003_v2 }
  0x9b   : > { %v318_v14 = vpop.permute.xlu1 %317  ;;  %v316_v15 = vpop.permute.xlu0 %315 }
  0x9c   : > { %377 = vst [vmem:[#allocation2 + $0x30] sm:$0xf0] %v373_v9  ;;  %378 = vst [vmem:[#allocation2 + $0x38] sm:$0xf0] %v374_v10  ;;  %v320_v16 = vsel %vm319_vm0, %v316_v15, %v318_v14  ;;  %v321_v17 = vsel %vm319_vm0, %v318_v14, %v316_v15  ;;  %1249 = vmatprep.subr.bf16.mxu0 %v1248_v12  ;;  %1312 = vmatprep.subr.bf16.mxu1 %v1248_v12 }
  0x9d   : > { %v324_v18 = vsel %vm1721_vm8, %v321_v17, 0.0  ;;  %v325_v19 = vsel %vm1736_vm9, %v320_v16, 0.0  ;;  %813 = vrot.lane.b32.xlu1 %v1510_v1, %s1448_s6  ;;  %811 = vrot.lane.b32.xlu0 %v1503_v0, %s1448_s6  ;;  %vm1756_vm0 = vmand %vm221_vm3, %vm243_vm6  ;;  %vm396_vm3 = vcmp.lt.s32.totalorder %v1565_v3, 33  ;;  %vm426_vm9 = vcmp.lt.s32.totalorder %v1565_v3, 31 }
  0x9e   : > { %326 = vst [vmem:[#allocation2 + $0x20] sm:$0xf] %v324_v18  ;;  %327 = vst [vmem:[#allocation2 + $0x28] sm:$0xf] %v325_v19  ;;  %1251 = vmatpush1.bf16.msra.mxu0 %v1250_v13  ;;  %1328 = vmatpush1.bf16.msra.mxu1 %v1250_v13 }
  0x9f   : > { %vm355_vm8 = vmand %vm222_vm4, %vm2376_vm11  ;;  %v350_v21 = vpop.permute.xlu1 %349  ;;  %v348_v22 = vpop.permute.xlu0 %347 }
  0xa0   : > { %v352_v23 = vsel %vm351_vm2, %v348_v22, %v350_v21  ;;  %v353_v24 = vsel %vm351_vm2, %v350_v21, %v348_v22  ;;  %vm1773_vm4 = vmand %vm225_vm15, %vm231_vm13 }
  0xa1   : > { %v356_v25 = vsel %vm1756_vm0, %v353_v24, 0.0  ;;  %v357_v26 = vsel %vm355_vm8, %v352_v23, 0.0  ;;  %843 = vrot.lane.b32.xlu1 %v1510_v1, %s1449_s7  ;;  %841 = vrot.lane.b32.xlu0 %v1503_v0, %s1449_s7  ;;  %vm400_vm2 = vmand %vm226_vm1, %vm2379_vm14 }
  0xa2   : > { %358 = vst [vmem:[#allocation2 + $0x30] sm:$0xf] %v356_v25  ;;  %359 = vst [vmem:[#allocation2 + $0x38] sm:$0xf] %v357_v26 }
  0xa3   : > { %v395_v28 = vpop.permute.xlu1 %394  ;;  %v393_v29 = vpop.permute.xlu0 %392  ;;  %vm1790_vm0 = vmand %vm225_vm15, %vm235_vm10 }
  0xa4   : > { %v397_v30 = vsel %vm396_vm3, %v393_v29, %v395_v28  ;;  %v398_v31 = vsel %vm396_vm3, %v395_v28, %v393_v29  ;;  %vm1798_vm8 = vmand %vm226_vm1, %vm236_vm12 }
  0xa5   : > { %v401_v32 = vsel %vm1773_vm4, %v398_v31, 0.0  ;;  %v402_v33 = vsel %vm400_vm2, %v397_v30, 0.0  ;;  %800 = vrot.lane.b32.xlu1 %v1510_v1, %s1450_s8  ;;  %798 = vrot.lane.b32.xlu0 %v1503_v0, %s1450_s8  ;;  %vm1806_vm3 = vmand %vm225_vm15, %vm2378_vm5  ;;  %v1008_v43 = vld [vmem:[#allocation2 + $0x28] sm:$0xff]  ;;  %vm383_vm4 = vcmp.lt.s32.totalorder %v1565_v3, 34  ;;  %v1007_v47 = vld [vmem:[#allocation2 + $0x20] sm:$0xff] }
  0xa6   : > { %v405_v35 = vrot.slane %v401_v32, 4  ;;  %v406_v36 = vrot.slane %v402_v33, 4  ;;  %vm1821_vm2 = vmand %vm226_vm1, %vm2377_vm7 }
  0xa7   : > { %v425_v38 = vpop.permute.xlu1 %424  ;;  %v423_v39 = vpop.permute.xlu0 %422 }
  0xa8   : > { %409 = vst [vmem:[#allocation2 + $0x40] sm:$0xf0] %v405_v35  ;;  %410 = vst [vmem:[#allocation2 + $0x48] sm:$0xf0] %v406_v36  ;;  %v427_v40 = vsel %vm426_vm9, %v423_v39, %v425_v38  ;;  %v428_v41 = vsel %vm426_vm9, %v425_v38, %v423_v39  ;;  %vm415_vm9 = vcmp.lt.s32.totalorder %v1565_v3, 32 }
  0xa9   : > { %v431_v44 = vsel %vm1790_vm0, %v428_v41, 0.0  ;;  %v432_v45 = vsel %vm1798_vm8, %v427_v40, 0.0  ;;  %832 = vrot.lane.b32.xlu1 %v1510_v1, %s1451_s9  ;;  %830 = vrot.lane.b32.xlu0 %v1503_v0, %s1451_s9  ;;  %v1010_v46 = vld [vmem:[#allocation2 + $0x38] sm:$0xff]  ;;  %v1009_v48 = vld [vmem:[#allocation2 + $0x30] sm:$0xff]  ;;  %vm458_vm0 = vcmp.lt.s32.totalorder %v1565_v3, 29  ;;  %vm1843_vm8 = vmand %vm225_vm15, %vm243_vm6 }
  0xaa   : > { %v435_v49 = vrot.slane %v431_v44, 4  ;;  %v436_v50 = vrot.slane %v432_v45, 4  ;;  %v1252_v52 = vpack.c.bf16 %v1010_v46, %v1008_v43  ;;  %v1254_v53 = vpack.c.bf16 %v1009_v48, %v1007_v47 }
  0xab   : > { %v382_v54 = vpop.permute.xlu1 %381  ;;  %v380_v55 = vpop.permute.xlu0 %379 }
  0xac   : > { %439 = vst [vmem:[#allocation2 + $0x50] sm:$0xf0] %v435_v49  ;;  %440 = vst [vmem:[#allocation2 + $0x58] sm:$0xf0] %v436_v50  ;;  %v384_v56 = vsel %vm383_vm4, %v380_v55, %v382_v54  ;;  %v385_v57 = vsel %vm383_vm4, %v382_v54, %v380_v55  ;;  %1253 = vmatprep.subr.bf16.mxu0 %v1252_v52  ;;  %1313 = vmatprep.subr.bf16.mxu1 %v1252_v52  ;;  %vm229_vm4 = vcmp.ge.s32.totalorder %v1578_v7, 1 }
  0xad   : > { %v388_v58 = vsel %vm1806_vm3, %v385_v57, 0.0  ;;  %v389_v59 = vsel %vm1821_vm2, %v384_v56, 0.0  ;;  %875 = vrot.lane.b32.xlu1 %v1510_v1, %s1452_s10  ;;  %873 = vrot.lane.b32.xlu0 %v1503_v0, %s1452_s10  ;;  %vm462_vm3 = vmand %vm226_vm1, %vm2376_vm11  ;;  %vm230_vm2 = vcmp.ge.s32.totalorder %v1580_v8, 1 }
  0xae   : > { %390 = vst [vmem:[#allocation2 + $0x40] sm:$0xf] %v388_v58  ;;  %391 = vst [vmem:[#allocation2 + $0x48] sm:$0xf] %v389_v59  ;;  %1255 = vmatpush1.bf16.msra.mxu0 %v1254_v53  ;;  %1329 = vmatpush1.bf16.msra.mxu1 %v1254_v53 }
  0xaf   : > { %v414_v60 = vpop.permute.xlu1 %413  ;;  %v412_v61 = vpop.permute.xlu0 %411  ;;  %vm1862_vm11 = vmand %vm229_vm4, %vm2378_vm5 }
  0xb0   : > { %v416_v62 = vsel %vm415_vm9, %v412_v61, %v414_v60  ;;  %v417_v63 = vsel %vm415_vm9, %v414_v60, %v412_v61  ;;  %vm490_vm9 = vcmp.lt.s32.totalorder %v1565_v3, 18 }
  0xb1   : > { %v418_v2 = vsel %vm225_vm15, %v417_v63, 0.0  ;;  %v419_v4 = vsel %vm226_vm1, %v416_v62, 0.0  ;;  %907 = vrot.lane.b32.xlu1 %v1510_v1, %s1453_s11  ;;  %905 = vrot.lane.b32.xlu0 %v1503_v0, %s1453_s11  ;;  %s1247_s11 = sshll.u32 %s2510_s16, 5 }
  0xb2   : > { %420 = vst [vmem:[#allocation2 + $0x50] sm:$0xf] %v418_v2  ;;  %421 = vst [vmem:[#allocation2 + $0x58] sm:$0xf] %v419_v4  ;;  %v1462_v2 = vmov 0  }
  0xb3   : > { %v457_v10 = vpop.permute.xlu1 %456  ;;  %v455_v11 = vpop.permute.xlu0 %454  ;;  %1403 = vset.pattern.permute.xlu1 %v1462_v2  ;;  %1402 = vset.pattern.permute.xlu0 %v1462_v2 }
  0xb4   : > { %v459_v12 = vsel %vm458_vm0, %v455_v11, %v457_v10  ;;  %v460_v13 = vsel %vm458_vm0, %v457_v10, %v455_v11  ;;  %vm1870_vm0 = vmand %vm230_vm2, %vm2377_vm7 }
  0xb5   : > { %v463_v14 = vsel %vm1843_vm8, %v460_v13, 0.0  ;;  %v464_v15 = vsel %vm462_vm3, %v459_v12, 0.0  ;;  %862 = vrot.lane.b32.xlu1 %v1510_v1, %s1454_s12  ;;  %860 = vrot.lane.b32.xlu0 %v1503_v0, %s1454_s12  ;;  %vm2422_vm8 = vcmp.lt.s32.totalorder %v1571_v5, 14  ;;  %v1012_v25 = vld [vmem:[#allocation2 + $0x48] sm:$0xff]  ;;  %v1011_v29 = vld [vmem:[#allocation2 + $0x40] sm:$0xff] }
  0xb6   : > { %v467_v17 = vrot.slane %v463_v14, 4  ;;  %v468_v18 = vrot.slane %v464_v15, 4  ;;  %vm1878_vm3 = vmand %vm225_vm15, %vm2422_vm8  ;;  %vm2425_vm15 = vcmp.lt.s32.totalorder %v1575_v6, 14 }
  0xb7   : > { %v489_v20 = vpop.permute.xlu1 %488  ;;  %v487_v21 = vpop.permute.xlu0 %486 }
  0xb8   : > { %471 = vst [vmem:[#allocation2 + $0x60] sm:$0xf0] %v467_v17  ;;  %472 = vst [vmem:[#allocation2 + $0x68] sm:$0xf0] %v468_v18  ;;  %v491_v22 = vsel %vm490_vm9, %v487_v21, %v489_v20  ;;  %v492_v23 = vsel %vm490_vm9, %v489_v20, %v487_v21  ;;  %vm445_vm9 = vcmp.lt.s32.totalorder %v1565_v3, 30 }
  0xb9   : > { %v495_v26 = vsel %vm1862_vm11, %v492_v23, 0.0  ;;  %v496_v27 = vsel %vm1870_vm0, %v491_v22, 0.0  ;;  %894 = vrot.lane.b32.xlu1 %v1510_v1, %s1455_s13  ;;  %892 = vrot.lane.b32.xlu0 %v1503_v0, %s1455_s13  ;;  %v1014_v28 = vld [vmem:[#allocation2 + $0x58] sm:$0xff]  ;;  %v1013_v30 = vld [vmem:[#allocation2 + $0x50] sm:$0xff]  ;;  %vm1893_vm11 = vmand %vm226_vm1, %vm2425_vm15  ;;  %vm477_vm1 = vcmp.lt.s32.totalorder %v1565_v3, 19  ;;  %vm2428_vm0 = vcmp.ge.s32.totalorder %v1571_v5, 3 }
  0xba   : > { %v499_v31 = vrot.slane %v495_v26, 4  ;;  %v500_v32 = vrot.slane %v496_v27, 4  ;;  %v1256_v34 = vpack.c.bf16 %v1014_v28, %v1012_v25  ;;  %v1258_v35 = vpack.c.bf16 %v1013_v30, %v1011_v29  ;;  %vm1908_vm8 = vmand %vm229_vm4, %vm2428_vm0 }
  0xbb   : > { %v444_v36 = vpop.permute.xlu1 %443  ;;  %v442_v37 = vpop.permute.xlu0 %441  ;;  %vm522_vm15 = vcmp.lt.s32.totalorder %v1565_v3, 16 }
  0xbc   : > { %503 = vst [vmem:[#allocation2 + $0x70] sm:$0xf0] %v499_v31  ;;  %504 = vst [vmem:[#allocation2 + $0x78] sm:$0xf0] %v500_v32  ;;  %v446_v38 = vsel %vm445_vm9, %v442_v37, %v444_v36  ;;  %v447_v39 = vsel %vm445_vm9, %v444_v36, %v442_v37  ;;  %1257 = vmatprep.subr.bf16.mxu0 %v1256_v34  ;;  %1314 = vmatprep.subr.bf16.mxu1 %v1256_v34 }
  0xbd   : > { %v450_v40 = vsel %vm1878_vm3, %v447_v39, 0.0  ;;  %v451_v41 = vsel %vm1893_vm11, %v446_v38, 0.0  ;;  %939 = vrot.lane.b32.xlu1 %v1510_v1, %s1456_s14  ;;  %937 = vrot.lane.b32.xlu0 %v1503_v0, %s1456_s14  ;;  %vm2431_vm3 = vcmp.ge.s32.totalorder %v1575_v6, 3  ;;  %vm552_vm11 = vcmp.lt.s32.totalorder %v1565_v3, 14  ;;  %s197_s14 = scalar_lea.vmem %s2371_s4, %s1247_s11 }
  0xbe   : > { %452 = vst [vmem:[#allocation2 + $0x60] sm:$0xf] %v450_v40  ;;  %453 = vst [vmem:[#allocation2 + $0x68] sm:$0xf] %v451_v41  ;;  %1259 = vmatpush1.bf16.msra.mxu0 %v1258_v35  ;;  %1330 = vmatpush1.bf16.msra.mxu1 %v1258_v35 }
  0xbf   : > { %vm481_vm9 = vmand %vm230_vm2, %vm2431_vm3  ;;  %v476_v43 = vpop.permute.xlu1 %475  ;;  %v474_v44 = vpop.permute.xlu0 %473 }
  0xc0   : > { %v478_v45 = vsel %vm477_vm1, %v474_v44, %v476_v43  ;;  %v479_v46 = vsel %vm477_vm1, %v476_v43, %v474_v44  ;;  %vm2432_vm1 = vcmp.lt.s32.totalorder %v1571_v5, 14 }
  0xc1   : > { %v482_v47 = vsel %vm1908_vm8, %v479_v46, 0.0  ;;  %v483_v48 = vsel %vm481_vm9, %v478_v45, 0.0  ;;  %969 = vrot.lane.b32.xlu1 %v1510_v1, %s1457_s17  ;;  %967 = vrot.lane.b32.xlu0 %v1503_v0, %s1457_s17  ;;  %vm1934_vm0 = vmand %vm229_vm4, %vm2432_vm1  ;;  %vm2435_vm8 = vcmp.lt.s32.totalorder %v1575_v6, 14  ;;  %vm539_vm1 = vcmp.lt.s32.totalorder %v1565_v3, 15 }
  0xc2   : > { %484 = vst [vmem:[#allocation2 + $0x70] sm:$0xf] %v482_v47  ;;  %485 = vst [vmem:[#allocation2 + $0x78] sm:$0xf] %v483_v48  ;;  %v1000_v48 = vld [vmem:[%s2368_s1 + $0x8] sm:$0xff] }
  0xc3   : > { %v521_v49 = vpop.permute.xlu1 %520  ;;  %v519_v50 = vpop.permute.xlu0 %518  ;;  %vm1942_vm3 = vmand %vm230_vm2, %vm2435_vm8  ;;  %1131 = vmatprep.mubr.f32.mxu0 %v1000_v48 }
  0xc4   : > { %v523_v52 = vsel %vm522_vm15, %v519_v50, %v521_v49  ;;  %v524_v53 = vsel %vm522_vm15, %v521_v49, %v519_v50  ;;  %vm1950_vm9 = vmand %vm229_vm4, %vm231_vm13  ;;  %vm509_vm15 = vcmp.lt.s32.totalorder %v1565_v3, 17 }
  0xc5   : > { %v525_v54 = vsel %vm229_vm4, %v524_v53, 0.0  ;;  %v526_v55 = vsel %vm230_vm2, %v523_v52, 0.0  ;;  %926 = vrot.lane.b32.xlu1 %v1510_v1, %s1459_s18  ;;  %924 = vrot.lane.b32.xlu0 %v1503_v0, %s1459_s18  ;;  %v1016_v4 = vld [vmem:[#allocation2 + $0x68] sm:$0xff]  ;;  %v1015_v12 = vld [vmem:[#allocation2 + $0x60] sm:$0xff]  ;;  %vm543_vm8 = vmand %vm230_vm2, %vm236_vm12 }
  0xc6   : > { %v529_v57 = vrot.slane %v525_v54, 4  ;;  %v530_v58 = vrot.slane %v526_v55, 4  ;;  %v1002_v55 = vld [vmem:[%s2368_s1 + $0x18] sm:$0xff] }
  0xc7   : > { %v551_v60 = vpop.permute.xlu1 %550  ;;  %v549_v61 = vpop.permute.xlu0 %548  ;;  %1137 = vmatprep.mubr.f32.mxu1 %v1002_v55 }
  0xc8   : > { %533 = vst [vmem:[#allocation2 + $0x80] sm:$0xf0] %v529_v57  ;;  %534 = vst [vmem:[#allocation2 + $0x88] sm:$0xf0] %v530_v58  ;;  %v553_v62 = vsel %vm552_vm11, %v549_v61, %v551_v60  ;;  %v554_v63 = vsel %vm552_vm11, %v551_v60, %v549_v61  ;;  %v246_v60 = vld [vmem:[%s2369_s2 + $0x8] sm:$0xff]  ;;  %v245_v61 = vld [vmem:[%s2369_s2] sm:$0xff] }
  0xc9   : > { %v557_v9 = vsel %vm1934_vm0, %v554_v63, 0.0  ;;  %v558_v10 = vsel %vm1942_vm3, %v553_v62, 0.0  ;;  %956 = vrot.lane.b32.xlu1 %v1510_v1, %s1460_s19  ;;  %954 = vrot.lane.b32.xlu0 %v1503_v0, %s1460_s19  ;;  %v1018_v11 = vld [vmem:[#allocation2 + $0x78] sm:$0xff]  ;;  %v1017_v13 = vld [vmem:[#allocation2 + $0x70] sm:$0xff]  ;;  %vm1965_vm11 = vmand %vm230_vm2, %vm2379_vm14  ;;  %vm584_vm3 = vcmp.lt.s32.totalorder %v1565_v3, 3 }
  0xca   : > { %v561_v14 = vrot.slane %v557_v9, 4  ;;  %v562_v15 = vrot.slane %v558_v10, 4  ;;  %v1260_v17 = vpack.c.bf16 %v1018_v11, %v1016_v4  ;;  %v1262_v18 = vpack.c.bf16 %v1017_v13, %v1015_v12  ;;  %vm542_vm0 = vmand %vm229_vm4, %vm235_vm10  ;;  %v247_v12 = vld [vmem:[%s2370_s3] sm:$0xff]  ;;  %v248_v13 = vld [vmem:[%s2370_s3 + $0x8] sm:$0xff] }
  0xcb   : > { %v508_v19 = vpop.permute.xlu1 %507  ;;  %v506_v20 = vpop.permute.xlu0 %505 }
  0xcc   : > { %565 = vst [vmem:[#allocation2 + $0x90] sm:$0xf0] %v561_v14  ;;  %566 = vst [vmem:[#allocation2 + $0x98] sm:$0xf0] %v562_v15  ;;  %v510_v21 = vsel %vm509_vm15, %v506_v20, %v508_v19  ;;  %v511_v22 = vsel %vm509_vm15, %v508_v19, %v506_v20  ;;  %1261 = vmatprep.subr.bf16.mxu0 %v1260_v17  ;;  %1315 = vmatprep.subr.bf16.mxu1 %v1260_v17  ;;  %vm2443_vm15 = vcmp.ge.s32.totalorder %v1575_v6, 3 }
  0xcd   : > { %v514_v23 = vsel %vm1950_vm9, %v511_v22, 0.0  ;;  %v515_v24 = vsel %vm1965_vm11, %v510_v21, 0.0  ;;  %988 = vrot.lane.b32.xlu1 %v1510_v1, %s1461_s20  ;;  %986 = vrot.lane.b32.xlu0 %v1503_v0, %s1461_s20  ;;  %vm2442_vm9 = vcmp.ge.s32.totalorder %v1571_v5, 3  ;;  %vm612_vm11 = vcmp.lt.s32.totalorder %v1565_v3, 1 }
  0xce   : > { %516 = vst [vmem:[#allocation2 + $0x80] sm:$0xf] %v514_v23  ;;  %517 = vst [vmem:[#allocation2 + $0x88] sm:$0xf] %v515_v24  ;;  %1263 = vmatpush1.bf16.msra.mxu0 %v1262_v18  ;;  %1331 = vmatpush1.bf16.msra.mxu1 %v1262_v18 }
  0xcf   : > { %v538_v25 = vpop.permute.xlu1 %537  ;;  %v536_v1 = vpop.permute.xlu0 %535 }
  0xd0   : > { %v540_v26 = vsel %vm539_vm1, %v536_v1, %v538_v25  ;;  %v541_v0 = vsel %vm539_vm1, %v538_v25, %v536_v1  ;;  %vm1994_vm1 = vmand %vm229_vm4, %vm243_vm6  ;;  %vm2446_vm4 = vcmp.lt.s32.totalorder %v1575_v6, 13 }
  0xd1   : > { %v544_v27 = vsel %vm542_vm0, %v541_v0, 0.0  ;;  %v545_v28 = vsel %vm543_vm8, %v540_v26, 0.0  ;;  %vm571_vm0 = vcmp.lt.s32.totalorder %v1565_v3, 13  ;;  %vm2010_vm8 = vmand %vm230_vm2, %vm2446_vm4  ;;  %vm601_vm2 = vcmp.lt.s32.totalorder %v1565_v3, 2  ;;  %1151 = vperm.xlu1 %1403, %v246_v60   ;;  %1146 = vperm.xlu0 %1402, %v245_v61  }
  0xd2   : > { %546 = vst [vmem:[#allocation2 + $0x90] sm:$0xf] %v544_v27  ;;  %547 = vst [vmem:[#allocation2 + $0x98] sm:$0xf] %v545_v28 }
  0xd3   : > { %v583_v29 = vpop.permute.xlu1 %582  ;;  %v581_v30 = vpop.permute.xlu0 %580 }
  0xd4   : > { %v585_v31 = vsel %vm584_vm3, %v581_v30, %v583_v29  ;;  %v586_v32 = vsel %vm584_vm3, %v583_v29, %v581_v30  ;;  %vm631_vm3 = vcmp.lt.s32.totalorder %v1565_v3, 127 }
  0xd5   : > { %v587_v33 = vsel %vm2442_vm9, %v586_v32, 0.0  ;;  %v588_v34 = vsel %vm2443_vm15, %v585_v31, 0.0  ;;  %v1020_v42 = vld [vmem:[#allocation2 + $0x88] sm:$0xff]  ;;  %v1019_v43 = vld [vmem:[#allocation2 + $0x80] sm:$0xff]  ;;  %1160 = vperm.xlu1 %1403, %v247_v12   ;;  %1165 = vperm.xlu0 %1402, %v248_v13   ;;  %vm659_vm9 = vcmp.lt.s32.totalorder %v1565_v3, 125  ;;  %vm648_vm15 = vcmp.lt.s32.totalorder %v1565_v3, 126 }
  0xd6   : > { %v591_v35 = vrot.slane %v587_v33, 4  ;;  %v592_v36 = vrot.slane %v588_v34, 4 }
  0xd7   : > { %v611_v37 = vpop.permute.xlu1 %610  ;;  %v609_v38 = vpop.permute.xlu0 %608 }
  0xd8   : > { %595 = vst [vmem:[#allocation2 + $0xa0] sm:$0xf0] %v591_v35  ;;  %596 = vst [vmem:[#allocation2 + $0xa8] sm:$0xf0] %v592_v36  ;;  %v613_v39 = vsel %vm612_vm11, %v609_v38, %v611_v37  ;;  %v614_v40 = vsel %vm612_vm11, %v611_v37, %v609_v38 }
  0xd9   : > { %v615_v44 = vsel %vm231_vm13, %v614_v40, 0.0  ;;  %v616_v45 = vsel %vm2379_vm14, %v613_v39, 0.0  ;;  %v1022_v46 = vld [vmem:[#allocation2 + $0x98] sm:$0xff]  ;;  %v1021_v47 = vld [vmem:[#allocation2 + $0x90] sm:$0xff]  ;;  %vm2449_vm11 = vmmov %vm2446_vm4  ;;  %vm2450_vm4 = vcmp.lt.s32.totalorder %v1571_v5, 14 }
  0xda   : > { %v619_v49 = vrot.slane %v615_v44, 4  ;;  %v620_v50 = vrot.slane %v616_v45, 4  ;;  %v1264_v53 = vpack.c.bf16 %v1022_v46, %v1020_v42  ;;  %v1266_v54 = vpack.c.bf16 %v1021_v47, %v1019_v43 }
  0xdb   : > { %v570_v56 = vpop.permute.xlu1 %569  ;;  %v568_v57 = vpop.permute.xlu0 %567 }
  0xdc   : > { %623 = vst [vmem:[#allocation2 + $0xb0] sm:$0xf0] %v619_v49  ;;  %624 = vst [vmem:[#allocation2 + $0xb8] sm:$0xf0] %v620_v50  ;;  %v572_v58 = vsel %vm571_vm0, %v568_v57, %v570_v56  ;;  %v573_v59 = vsel %vm571_vm0, %v570_v56, %v568_v57  ;;  %1265 = vmatprep.subr.bf16.mxu0 %v1264_v53  ;;  %1316 = vmatprep.subr.bf16.mxu1 %v1264_v53  ;;  %vm234_vm0 = vcmp.lt.s32.totalorder %v1580_v8, 15 }
  0xdd   : > { %v576_v62 = vsel %vm1994_vm1, %v573_v59, 0.0  ;;  %v577_v63 = vsel %vm2010_vm8, %v572_v58, 0.0  ;;  %1267 = vmatpush1.bf16.msra.mxu0 %v1266_v54  ;;  %1332 = vmatpush1.bf16.msra.mxu1 %v1266_v54  ;;  %vm233_vm1 = vcmp.lt.s32.totalorder %v1578_v7, 15  ;;  %vm2451_vm8 = vcmp.lt.s32.totalorder %v1575_v6, 14 }
  0xde   : > { %578 = vst [vmem:[#allocation2 + $0xa0] sm:$0xf] %v576_v62  ;;  %579 = vst [vmem:[#allocation2 + $0xa8] sm:$0xf] %v577_v63 }
  0xdf   : > { %v600_v4 = vpop.permute.xlu1 %599  ;;  %v598_v9 = vpop.permute.xlu0 %597 }
  0xe0   : > { %v602_v10 = vsel %vm601_vm2, %v598_v9, %v600_v4  ;;  %v603_v11 = vsel %vm601_vm2, %v600_v4, %v598_v9  ;;  %vm689_vm2 = vcmp.lt.s32.totalorder %v1565_v3, 114 }
  0xe1   : > { %v604_v14 = vsel %vm2378_vm5, %v603_v11, 0.0  ;;  %v605_v15 = vsel %vm2377_vm7, %v602_v10, 0.0 }
  0xe2   : > { %606 = vst [vmem:[#allocation2 + $0xb0] sm:$0xf] %v604_v14  ;;  %607 = vst [vmem:[#allocation2 + $0xb8] sm:$0xf] %v605_v15 }
  0xe3   : > { %v630_v16 = vpop.permute.xlu1 %629  ;;  %v628_v17 = vpop.permute.xlu0 %627 }
  0xe4   : > { %v632_v18 = vsel %vm631_vm3, %v628_v17, %v630_v16  ;;  %v633_v19 = vsel %vm631_vm3, %v630_v16, %v628_v17  ;;  %vm692_vm3 = vmand %vm233_vm1, %vm2378_vm5  ;;  %vm237_vm5 = vcmp.lt.s32.totalorder %v1578_v7, 14 }
  0xe5   : > { %v634_v20 = vsel %vm235_vm10, %v632_v18, 0.0  ;;  %v635_v21 = vsel %vm236_vm12, %v633_v19, 0.0  ;;  %v1024_v0 = vld [vmem:[#allocation2 + $0xa8] sm:$0xff]  ;;  %v1023_v30 = vld [vmem:[#allocation2 + $0xa0] sm:$0xff] }
  0xe6   : > { %v638_v22 = vrot.slane %v634_v20, 4  ;;  %v639_v23 = vrot.slane %v635_v21, 4 }
  0xe7   : > { %v658_v24 = vpop.permute.xlu1 %657  ;;  %v656_v25 = vpop.permute.xlu0 %655 }
  0xe8   : > { %642 = vst [vmem:[#allocation2 + $0xc0] sm:$0xf0] %v638_v22  ;;  %643 = vst [vmem:[#allocation2 + $0xc8] sm:$0xf0] %v639_v23  ;;  %v660_v1 = vsel %vm659_vm9, %v656_v25, %v658_v24  ;;  %v661_v26 = vsel %vm659_vm9, %v658_v24, %v656_v25 }
  0xe9   : > { %v662_v27 = vsel %vm243_vm6, %v660_v1, 0.0  ;;  %v663_v28 = vsel %vm2449_vm11, %v661_v26, 0.0  ;;  %v1026_v29 = vld [vmem:[#allocation2 + $0xb8] sm:$0xff]  ;;  %v1025_v31 = vld [vmem:[#allocation2 + $0xb0] sm:$0xff]  ;;  %vm693_vm9 = vmand %vm234_vm0, %vm2377_vm7  ;;  %vm2452_vm11 = vcmp.ge.s32.totalorder %v1571_v5, 3 }
  0xea   : > { %v666_v32 = vrot.slane %v662_v27, 4  ;;  %v667_v33 = vrot.slane %v663_v28, 4  ;;  %v1268_v34 = vpack.c.bf16 %v1026_v29, %v1024_v0  ;;  %v1270_v35 = vpack.c.bf16 %v1025_v31, %v1023_v30 }
  0xeb   : > { %v647_v36 = vpop.permute.xlu1 %646  ;;  %v645_v37 = vpop.permute.xlu0 %644 }
  0xec   : > { %670 = vst [vmem:[#allocation2 + $0xd0] sm:$0xf0] %v666_v32  ;;  %671 = vst [vmem:[#allocation2 + $0xd8] sm:$0xf0] %v667_v33  ;;  %v649_v38 = vsel %vm648_vm15, %v645_v37, %v647_v36  ;;  %v650_v39 = vsel %vm648_vm15, %v647_v36, %v645_v37  ;;  %1269 = vmatprep.subr.bf16.mxu0 %v1268_v34  ;;  %1317 = vmatprep.subr.bf16.mxu1 %v1268_v34  ;;  %vm721_vm15 = vcmp.lt.s32.totalorder %v1565_v3, 112 }
  0xed   : > { %v651_v40 = vsel %vm2450_vm4, %v649_v38, 0.0  ;;  %v652_v41 = vsel %vm2451_vm8, %v650_v39, 0.0  ;;  %1271 = vmatpush1.bf16.msra.mxu0 %v1270_v35  ;;  %1333 = vmatpush1.bf16.msra.mxu1 %v1270_v35  ;;  %vm2077_vm4 = vmand %vm233_vm1, %vm2452_vm11  ;;  %vm676_vm8 = vcmp.lt.s32.totalorder %v1565_v3, 115 }
  0xee   : > { %653 = vst [vmem:[#allocation2 + $0xd0] sm:$0xf] %v651_v40  ;;  %654 = vst [vmem:[#allocation2 + $0xd8] sm:$0xf] %v652_v41 }
  0xef   : > { %v688_v42 = vpop.permute.xlu1 %687  ;;  %v686_v43 = vpop.permute.xlu0 %685  ;;  %v1028_v56 = vld [vmem:[#allocation2 + $0xc8] sm:$0xff]  ;;  %v1027_v60 = vld [vmem:[#allocation2 + $0xc0] sm:$0xff]  ;;  %vm712_vm11 = vmand %vm234_vm0, %vm2379_vm14 }
  0xf0   : > { %v690_v44 = vsel %vm689_vm2, %v686_v43, %v688_v42  ;;  %v691_v45 = vsel %vm689_vm2, %v688_v42, %v686_v43  ;;  %vm2455_vm2 = vcmp.ge.s32.totalorder %v1575_v6, 3 }
  0xf1   : > { %v694_v46 = vsel %vm692_vm3, %v690_v44, 0.0  ;;  %v695_v47 = vsel %vm693_vm9, %v691_v45, 0.0  ;;  %vm2090_vm3 = vmand %vm234_vm0, %vm2455_vm2  ;;  %vm708_vm9 = vcmp.lt.s32.totalorder %v1565_v3, 113 }
  0xf2   : > { %v698_v48 = vrot.slane %v694_v46, 4  ;;  %v699_v49 = vrot.slane %v695_v47, 4 }
  0xf3   : > { %v720_v50 = vpop.permute.xlu1 %719  ;;  %v718_v52 = vpop.permute.xlu0 %717 }
  0xf4   : > { %702 = vst [vmem:[#allocation2 + $0xe0] sm:$0xf0] %v698_v48  ;;  %703 = vst [vmem:[#allocation2 + $0xe8] sm:$0xf0] %v699_v49  ;;  %v722_v53 = vsel %vm721_vm15, %v718_v52, %v720_v50  ;;  %v723_v54 = vsel %vm721_vm15, %v720_v50, %v718_v52 }
  0xf5   : > { %v724_v57 = vsel %vm233_vm1, %v722_v53, 0.0  ;;  %v725_v58 = vsel %vm234_vm0, %v723_v54, 0.0  ;;  %v1030_v59 = vld [vmem:[#allocation2 + $0xd8] sm:$0xff]  ;;  %v1029_v61 = vld [vmem:[#allocation2 + $0xd0] sm:$0xff]  ;;  %vm711_vm15 = vmand %vm233_vm1, %vm231_vm13 }
  0xf6   : > { %v728_v62 = vrot.slane %v724_v57, 4  ;;  %v729_v63 = vrot.slane %v725_v58, 4  ;;  %v1272_v4 = vpack.c.bf16 %v1030_v59, %v1028_v56  ;;  %v1274_v9 = vpack.c.bf16 %v1029_v61, %v1027_v60 }
  0xf7   : > { %v675_v10 = vpop.permute.xlu1 %674  ;;  %v673_v11 = vpop.permute.xlu0 %672 }
  0xf8   : > { %732 = vst [vmem:[#allocation2 + $0xf0] sm:$0xf0] %v728_v62  ;;  %733 = vst [vmem:[#allocation2 + $0xf8] sm:$0xf0] %v729_v63  ;;  %v677_v12 = vsel %vm676_vm8, %v673_v11, %v675_v10  ;;  %v678_v13 = vsel %vm676_vm8, %v675_v10, %v673_v11  ;;  %1273 = vmatprep.subr.bf16.mxu0 %v1272_v4  ;;  %1318 = vmatprep.subr.bf16.mxu1 %v1272_v4  ;;  %vm2458_vm8 = vcmp.lt.s32.totalorder %v1571_v5, 14 }
  0xf9   : > { %v681_v14 = vsel %vm2077_vm4, %v677_v12, 0.0  ;;  %v682_v15 = vsel %vm2090_vm3, %v678_v13, 0.0  ;;  %1275 = vmatpush1.bf16.msra.mxu0 %v1274_v9  ;;  %1334 = vmatpush1.bf16.msra.mxu1 %v1274_v9  ;;  %vm751_vm4 = vcmp.lt.s32.totalorder %v1565_v3, 110  ;;  %vm754_vm2 = vmand %vm233_vm1, %vm2458_vm8  ;;  %vm2459_vm3 = vcmp.lt.s32.totalorder %v1575_v6, 14 }
  0xfa   : > { %683 = vst [vmem:[#allocation2 + $0xe0] sm:$0xf] %v681_v14  ;;  %684 = vst [vmem:[#allocation2 + $0xe8] sm:$0xf] %v682_v15 }
  0xfb   : > { %v707_v16 = vpop.permute.xlu1 %706  ;;  %v705_v17 = vpop.permute.xlu0 %704  ;;  %vm755_vm7 = vmand %vm234_vm0, %vm2459_vm3  ;;  %vm2463_vm3 = vcmp.ge.s32.totalorder %v1575_v6, 3 }
  0xfc   : > { %v709_v18 = vsel %vm708_vm9, %v705_v17, %v707_v16  ;;  %v710_v19 = vsel %vm708_vm9, %v707_v16, %v705_v17  ;;  %vm238_vm9 = vcmp.lt.s32.totalorder %v1580_v8, 14 }
  0xfd   : > { %v713_v20 = vsel %vm711_vm15, %v709_v18, 0.0  ;;  %v714_v21 = vsel %vm712_vm11, %v710_v19, 0.0  ;;  %vm783_vm15 = vcmp.lt.s32.totalorder %v1565_v3, 99  ;;  %vm2460_vm11 = vcmp.ge.s32.totalorder %v1571_v5, 3  ;;  %vm2131_vm14 = vmand %vm238_vm9, %vm2463_vm3 }
  0xfe   : > { %715 = vst [vmem:[#allocation2 + $0xf0] sm:$0xf] %v713_v20  ;;  %716 = vst [vmem:[#allocation2 + $0xf8] sm:$0xf] %v714_v21  ;;  %vm815_vm3 = vcmp.lt.s32.totalorder %v1565_v3, 97 }
  0xff   : > { %v750_v22 = vpop.permute.xlu1 %749  ;;  %v748_v23 = vpop.permute.xlu0 %747  ;;  %vm2123_vm8 = vmand %vm237_vm5, %vm2460_vm11  ;;  %vm2470_vm11 = vcmp.lt.s32.totalorder %v1575_v6, 13 }
 0x100   : > { %v752_v24 = vsel %vm751_vm4, %v748_v23, %v750_v22  ;;  %v753_v25 = vsel %vm751_vm4, %v750_v22, %v748_v23  ;;  %vm738_vm4 = vcmp.lt.s32.totalorder %v1565_v3, 111 }
 0x101   : > { %v756_v1 = vsel %vm754_vm2, %v752_v24, 0.0  ;;  %v757_v26 = vsel %vm755_vm7, %v753_v25, 0.0  ;;  %vm2139_vm7 = vmand %vm233_vm1, %vm235_vm10  ;;  %v1032_v35 = vld [vmem:[#allocation2 + $0xe8] sm:$0xff]  ;;  %v1031_v39 = vld [vmem:[#allocation2 + $0xe0] sm:$0xff] }
 0x102   : > { %v760_v27 = vrot.slane %v756_v1, 4  ;;  %v761_v28 = vrot.slane %v757_v26, 4  ;;  %vm2152_vm2 = vmand %vm234_vm0, %vm236_vm12 }
 0x103   : > { %v782_v30 = vpop.permute.xlu1 %781  ;;  %v780_v31 = vpop.permute.xlu0 %779 }
 0x104   : > { %764 = vst [vmem:[#allocation2 + $0x100] sm:$0xf0] %v760_v27  ;;  %765 = vst [vmem:[#allocation2 + $0x108] sm:$0xf0] %v761_v28  ;;  %v784_v32 = vsel %vm783_vm15, %v780_v31, %v782_v30  ;;  %v785_v33 = vsel %vm783_vm15, %v782_v30, %v780_v31 }
 0x105   : > { %v788_v36 = vsel %vm2123_vm8, %v784_v32, 0.0  ;;  %v789_v37 = vsel %vm2131_vm14, %v785_v33, 0.0  ;;  %v1034_v38 = vld [vmem:[#allocation2 + $0xf8] sm:$0xff]  ;;  %v1033_v40 = vld [vmem:[#allocation2 + $0xf0] sm:$0xff]  ;;  %vm770_vm14 = vcmp.lt.s32.totalorder %v1565_v3, 109  ;;  %vm773_vm15 = vmand %vm233_vm1, %vm243_vm6 }
 0x106   : > { %v792_v41 = vrot.slane %v788_v36, 4  ;;  %v793_v42 = vrot.slane %v789_v37, 4  ;;  %v1276_v44 = vpack.c.bf16 %v1034_v38, %v1032_v35  ;;  %v1278_v45 = vpack.c.bf16 %v1033_v40, %v1031_v39  ;;  %vm774_vm8 = vmand %vm234_vm0, %vm2470_vm11 }
 0x107   : > { %v737_v46 = vpop.permute.xlu1 %736  ;;  %v735_v47 = vpop.permute.xlu0 %734  ;;  %vm818_vm1 = vmand %vm237_vm5, %vm231_vm13 }
 0x108   : > { %796 = vst [vmem:[#allocation2 + $0x110] sm:$0xf0] %v792_v41  ;;  %797 = vst [vmem:[#allocation2 + $0x118] sm:$0xf0] %v793_v42  ;;  %v739_v48 = vsel %vm738_vm4, %v735_v47, %v737_v46  ;;  %v740_v49 = vsel %vm738_vm4, %v737_v46, %v735_v47  ;;  %1277 = vmatprep.subr.bf16.mxu0 %v1276_v44  ;;  %1319 = vmatprep.subr.bf16.mxu1 %v1276_v44  ;;  %vm845_vm4 = vcmp.lt.s32.totalorder %v1565_v3, 95 }
 0x109   : > { %v743_v50 = vsel %vm2139_vm7, %v739_v48, 0.0  ;;  %v744_v52 = vsel %vm2152_vm2, %v740_v49, 0.0  ;;  %1279 = vmatpush1.bf16.msra.mxu0 %v1278_v45  ;;  %1335 = vmatpush1.bf16.msra.mxu1 %v1278_v45  ;;  %vm2471_vm7 = vcmp.ge.s32.totalorder %v1575_v6, 1  ;;  %vm2183_vm2 = vmand %vm237_vm5, %vm235_vm10 }
 0x10a   : > { %745 = vst [vmem:[#allocation2 + $0x100] sm:$0xf] %v743_v50  ;;  %746 = vst [vmem:[#allocation2 + $0x108] sm:$0xf] %v744_v52 }
 0x10b   : > { %v769_v53 = vpop.permute.xlu1 %768  ;;  %v767_v54 = vpop.permute.xlu0 %766  ;;  %vm819_vm0 = vmand %vm238_vm9, %vm2471_vm7  ;;  %vm834_vm7 = vcmp.lt.s32.totalorder %v1565_v3, 96 }
 0x10c   : > { %v771_v55 = vsel %vm770_vm14, %v767_v54, %v769_v53  ;;  %v772_v56 = vsel %vm770_vm14, %v769_v53, %v767_v54  ;;  %vm2191_vm14 = vmand %vm238_vm9, %vm236_vm12 }
 0x10d   : > { %v775_v57 = vsel %vm773_vm15, %v771_v55, 0.0  ;;  %v776_v58 = vsel %vm774_vm8, %v772_v56, 0.0  ;;  %vm2476_vm15 = vcmp.ge.s32.totalorder %v1571_v5, 2  ;;  %vm802_vm8 = vcmp.lt.s32.totalorder %v1565_v3, 98 }
 0x10e   : > { %777 = vst [vmem:[#allocation2 + $0x110] sm:$0xf] %v775_v57  ;;  %778 = vst [vmem:[#allocation2 + $0x118] sm:$0xf] %v776_v58 }
 0x10f   : > { %v814_v59 = vpop.permute.xlu1 %813  ;;  %v812_v60 = vpop.permute.xlu0 %811  ;;  %vm2199_vm11 = vmand %vm237_vm5, %vm2476_vm15  ;;  %vm241_vm15 = vcmp.lt.s32.totalorder %v1578_v7, 13 }
 0x110   : > { %v816_v61 = vsel %vm815_vm3, %v812_v60, %v814_v59  ;;  %v817_v62 = vsel %vm815_vm3, %v814_v59, %v812_v60  ;;  %vm2479_vm3 = vcmp.ge.s32.totalorder %v1575_v6, 2 }
 0x111   : > { %v820_v63 = vsel %vm818_vm1, %v816_v61, 0.0  ;;  %v821_v2 = vsel %vm819_vm0, %v817_v62, 0.0  ;;  %v1036_v17 = vld [vmem:[#allocation2 + $0x108] sm:$0xff]  ;;  %v1035_v21 = vld [vmem:[#allocation2 + $0x100] sm:$0xff]  ;;  %vm2212_vm1 = vmand %vm238_vm9, %vm2479_vm3  ;;  %vm877_vm0 = vcmp.lt.s32.totalorder %v1565_v3, 93  ;;  %vm2483_vm3 = vcmp.ge.s32.totalorder %v1571_v5, 2 }
 0x112   : > { %v824_v9 = vrot.slane %v820_v63, 4  ;;  %v825_v10 = vrot.slane %v821_v2, 4 }
 0x113   : > { %v844_v12 = vpop.permute.xlu1 %843  ;;  %v842_v13 = vpop.permute.xlu0 %841 }
 0x114   : > { %828 = vst [vmem:[#allocation2 + $0x120] sm:$0xf0] %v824_v9  ;;  %829 = vst [vmem:[#allocation2 + $0x128] sm:$0xf0] %v825_v10  ;;  %v846_v14 = vsel %vm845_vm4, %v842_v13, %v844_v12  ;;  %v847_v15 = vsel %vm845_vm4, %v844_v12, %v842_v13 }
 0x115   : > { %v850_v18 = vsel %vm2183_vm2, %v846_v14, 0.0  ;;  %v851_v19 = vsel %vm2191_vm14, %v847_v15, 0.0  ;;  %v1038_v20 = vld [vmem:[#allocation2 + $0x118] sm:$0xff]  ;;  %v1037_v22 = vld [vmem:[#allocation2 + $0x110] sm:$0xff]  ;;  %vm880_vm4 = vmand %vm237_vm5, %vm243_vm6  ;;  %vm2482_vm2 = vcmp.lt.s32.totalorder %v1575_v6, 13 }
 0x116   : > { %v854_v23 = vrot.slane %v850_v18, 4  ;;  %v855_v24 = vrot.slane %v851_v19, 4  ;;  %v1280_v1 = vpack.c.bf16 %v1038_v20, %v1036_v17  ;;  %v1282_v26 = vpack.c.bf16 %v1037_v22, %v1035_v21  ;;  %vm881_vm14 = vmand %vm238_vm9, %vm2482_vm2 }
 0x117   : > { %v801_v0 = vpop.permute.xlu1 %800  ;;  %v799_v27 = vpop.permute.xlu0 %798 }
 0x118   : > { %858 = vst [vmem:[#allocation2 + $0x130] sm:$0xf0] %v854_v23  ;;  %859 = vst [vmem:[#allocation2 + $0x138] sm:$0xf0] %v855_v24  ;;  %v803_v28 = vsel %vm802_vm8, %v799_v27, %v801_v0  ;;  %v804_v29 = vsel %vm802_vm8, %v801_v0, %v799_v27  ;;  %1281 = vmatprep.subr.bf16.mxu0 %v1280_v1  ;;  %1320 = vmatprep.subr.bf16.mxu1 %v1280_v1  ;;  %vm909_vm8 = vcmp.lt.s32.totalorder %v1565_v3, 82 }
 0x119   : > { %v807_v30 = vsel %vm2199_vm11, %v803_v28, 0.0  ;;  %v808_v31 = vsel %vm2212_vm1, %v804_v29, 0.0  ;;  %1283 = vmatpush1.bf16.msra.mxu0 %v1282_v26  ;;  %1336 = vmatpush1.bf16.msra.mxu1 %v1282_v26  ;;  %vm242_vm11 = vcmp.lt.s32.totalorder %v1580_v8, 13  ;;  %vm2241_vm1 = vmand %vm241_vm15, %vm2483_vm3  ;;  %vm2495_vm3 = vcmp.ge.s32.totalorder %v1571_v5, 3 }
 0x11a   : > { %809 = vst [vmem:[#allocation2 + $0x120] sm:$0xf] %v807_v30  ;;  %810 = vst [vmem:[#allocation2 + $0x128] sm:$0xf] %v808_v31 }
 0x11b   : > { %v833_v32 = vpop.permute.xlu1 %832  ;;  %v831_v33 = vpop.permute.xlu0 %830 }
 0x11c   : > { %v835_v34 = vsel %vm834_vm7, %v831_v33, %v833_v32  ;;  %v836_v35 = vsel %vm834_vm7, %v833_v32, %v831_v33  ;;  %vm2486_vm7 = vcmp.ge.s32.totalorder %v1575_v6, 2 }
 0x11d   : > { %v837_v36 = vsel %vm237_vm5, %v835_v34, 0.0  ;;  %v838_v37 = vsel %vm238_vm9, %v836_v35, 0.0  ;;  %vm2249_vm2 = vmand %vm242_vm11, %vm2486_vm7  ;;  %vm2496_vm7 = vcmp.ge.s32.totalorder %v1575_v6, 3 }
 0x11e   : > { %839 = vst [vmem:[#allocation2 + $0x130] sm:$0xf] %v837_v36  ;;  %840 = vst [vmem:[#allocation2 + $0x138] sm:$0xf] %v838_v37 }
 0x11f   : > { %v876_v38 = vpop.permute.xlu1 %875  ;;  %v874_v39 = vpop.permute.xlu0 %873 }
 0x120   : > { %v878_v40 = vsel %vm877_vm0, %v874_v39, %v876_v38  ;;  %v879_v41 = vsel %vm877_vm0, %v876_v38, %v874_v39  ;;  %vm2489_vm0 = vcmp.lt.s32.totalorder %v1571_v5, 14 }
 0x121   : > { %v882_v42 = vsel %vm880_vm4, %v878_v40, 0.0  ;;  %v883_v43 = vsel %vm881_vm14, %v879_v41, 0.0  ;;  %vm2257_vm4 = vmand %vm237_vm5, %vm2489_vm0  ;;  %v1040_v54 = vld [vmem:[#allocation2 + $0x128] sm:$0xff]  ;;  %vm864_vm14 = vcmp.lt.s32.totalorder %v1565_v3, 94  ;;  %v1039_v58 = vld [vmem:[#allocation2 + $0x120] sm:$0xff]  ;;  %vm941_vm0 = vcmp.lt.s32.totalorder %v1565_v3, 80 }
 0x122   : > { %v886_v45 = vrot.slane %v882_v42, 4  ;;  %v887_v46 = vrot.slane %v883_v43, 4 }
 0x123   : > { %v908_v48 = vpop.permute.xlu1 %907  ;;  %v906_v49 = vpop.permute.xlu0 %905 }
 0x124   : > { %890 = vst [vmem:[#allocation2 + $0x140] sm:$0xf0] %v886_v45  ;;  %891 = vst [vmem:[#allocation2 + $0x148] sm:$0xf0] %v887_v46  ;;  %v910_v50 = vsel %vm909_vm8, %v906_v49, %v908_v48  ;;  %v911_v52 = vsel %vm909_vm8, %v908_v48, %v906_v49  ;;  %vm2492_vm8 = vcmp.lt.s32.totalorder %v1575_v6, 14 }
 0x125   : > { %v914_v55 = vsel %vm2241_vm1, %v910_v50, 0.0  ;;  %v915_v56 = vsel %vm2249_vm2, %v911_v52, 0.0  ;;  %v1042_v57 = vld [vmem:[#allocation2 + $0x138] sm:$0xff]  ;;  %v1041_v59 = vld [vmem:[#allocation2 + $0x130] sm:$0xff]  ;;  %vm2270_vm5 = vmand %vm238_vm9, %vm2492_vm8  ;;  %vm896_vm9 = vcmp.lt.s32.totalorder %v1565_v3, 83 }
 0x126   : > { %v918_v60 = vrot.slane %v914_v55, 4  ;;  %v919_v61 = vrot.slane %v915_v56, 4  ;;  %v1284_v63 = vpack.c.bf16 %v1042_v57, %v1040_v54  ;;  %v1286_v2 = vpack.c.bf16 %v1041_v59, %v1039_v58  ;;  %vm899_vm1 = vmand %vm241_vm15, %vm2495_vm3 }
 0x127   : > { %v863_v4 = vpop.permute.xlu1 %862  ;;  %v861_v9 = vpop.permute.xlu0 %860  ;;  %vm900_vm2 = vmand %vm242_vm11, %vm2496_vm7  ;;  %vm2505_vm7 = vcmp.ge.s32.totalorder %v1575_v6, 1 }
 0x128   : > { %922 = vst [vmem:[#allocation2 + $0x150] sm:$0xf0] %v918_v60  ;;  %923 = vst [vmem:[#allocation2 + $0x158] sm:$0xf0] %v919_v61  ;;  %v865_v10 = vsel %vm864_vm14, %v861_v9, %v863_v4  ;;  %v866_v11 = vsel %vm864_vm14, %v863_v4, %v861_v9  ;;  %1285 = vmatprep.subr.bf16.mxu0 %v1284_v63  ;;  %1321 = vmatprep.subr.bf16.mxu1 %v1284_v63  ;;  %vm2497_vm14 = vcmp.lt.s32.totalorder %v1571_v5, 14 }
 0x129   : > { %v869_v12 = vsel %vm2257_vm4, %v865_v10, 0.0  ;;  %v870_v13 = vsel %vm2270_vm5, %v866_v11, 0.0  ;;  %1287 = vmatpush1.bf16.msra.mxu0 %v1286_v2  ;;  %1337 = vmatpush1.bf16.msra.mxu1 %v1286_v2  ;;  %vm971_vm4 = vcmp.lt.s32.totalorder %v1565_v3, 78  ;;  %vm2297_vm8 = vmand %vm241_vm15, %vm2497_vm14  ;;  %vm2500_vm5 = vcmp.lt.s32.totalorder %v1575_v6, 14 }
 0x12a   : > { %871 = vst [vmem:[#allocation2 + $0x140] sm:$0xf] %v869_v12  ;;  %872 = vst [vmem:[#allocation2 + $0x148] sm:$0xf] %v870_v13  ;;  %vm990_vm14 = vcmp.lt.s32.totalorder %v1565_v3, 77  ;;  %v1463_v11 = vmov 0.0|0.0  }
 0x12b   : > { %v895_v14 = vpop.permute.xlu1 %894  ;;  %v893_v15 = vpop.permute.xlu0 %892  ;;  %vm2313_vm3 = vmand %vm241_vm15, %vm231_vm13  ;;  %v1001_v12 = vld [vmem:[%s2368_s1 + $0x10] sm:$0xff] }
 0x12c   : > { %v897_v16 = vsel %vm896_vm9, %v893_v15, %v895_v14  ;;  %v898_v17 = vsel %vm896_vm9, %v895_v14, %v893_v15  ;;  %vm2305_vm9 = vmand %vm242_vm11, %vm2500_vm5 }
 0x12d   : > { %v901_v18 = vsel %vm899_vm1, %v897_v16, 0.0  ;;  %v902_v19 = vsel %vm900_vm2, %v898_v17, 0.0  ;;  %vm928_vm1 = vcmp.lt.s32.totalorder %v1565_v3, 81  ;;  %vm2326_vm13 = vmand %vm242_vm11, %vm2505_vm7  ;;  %vm958_vm2 = vcmp.lt.s32.totalorder %v1565_v3, 79 }
 0x12e   : > { %903 = vst [vmem:[#allocation2 + $0x150] sm:$0xf] %v901_v18  ;;  %904 = vst [vmem:[#allocation2 + $0x158] sm:$0xf] %v902_v19 }
 0x12f   : > { %v940_v20 = vpop.permute.xlu1 %939  ;;  %v938_v21 = vpop.permute.xlu0 %937 }
 0x130   : > { %v942_v22 = vsel %vm941_vm0, %v938_v21, %v940_v20  ;;  %v943_v23 = vsel %vm941_vm0, %v940_v20, %v938_v21  ;;  %vm961_vm0 = vmand %vm241_vm15, %vm235_vm10 }
 0x131   : > { %v944_v24 = vsel %vm241_vm15, %v942_v22, 0.0  ;;  %v945_v25 = vsel %vm242_vm11, %v943_v23, 0.0  ;;  %v1044_v33 = vld [vmem:[#allocation2 + $0x148] sm:$0xff]  ;;  %v1043_v37 = vld [vmem:[#allocation2 + $0x140] sm:$0xff]  ;;  %vm993_vm10 = vmand %vm241_vm15, %vm243_vm6 }
 0x132   : > { %v948_v26 = vrot.slane %v944_v24, 4  ;;  %v949_v0 = vrot.slane %v945_v25, 4 }
 0x133   : > { %v970_v28 = vpop.permute.xlu1 %969  ;;  %v968_v29 = vpop.permute.xlu0 %967 }
 0x134   : > { %952 = vst [vmem:[#allocation2 + $0x160] sm:$0xf0] %v948_v26  ;;  %953 = vst [vmem:[#allocation2 + $0x168] sm:$0xf0] %v949_v0  ;;  %v972_v30 = vsel %vm971_vm4, %v968_v29, %v970_v28  ;;  %v973_v31 = vsel %vm971_vm4, %v970_v28, %v968_v29 }
 0x135   : > { %v976_v34 = vsel %vm2297_vm8, %v972_v30, 0.0  ;;  %v977_v35 = vsel %vm2305_vm9, %v973_v31, 0.0  ;;  %v1046_v36 = vld [vmem:[#allocation2 + $0x158] sm:$0xff]  ;;  %v1045_v38 = vld [vmem:[#allocation2 + $0x150] sm:$0xff]  ;;  %vm962_vm4 = vmand %vm242_vm11, %vm236_vm12  ;;  %vm2508_vm8 = vcmp.lt.s32.totalorder %v1575_v6, 13 }
 0x136   : > { %v980_v39 = vrot.slane %v976_v34, 4  ;;  %v981_v40 = vrot.slane %v977_v35, 4  ;;  %v1288_v42 = vpack.c.bf16 %v1046_v36, %v1044_v33  ;;  %v1290_v43 = vpack.c.bf16 %v1045_v38, %v1043_v37  ;;  %vm994_vm12 = vmand %vm242_vm11, %vm2508_vm8 }
 0x137   : > { %v927_v44 = vpop.permute.xlu1 %926  ;;  %v925_v45 = vpop.permute.xlu0 %924 }
 0x138   : > { %984 = vst [vmem:[#allocation2 + $0x170] sm:$0xf0] %v980_v39  ;;  %985 = vst [vmem:[#allocation2 + $0x178] sm:$0xf0] %v981_v40  ;;  %v929_v46 = vsel %vm928_vm1, %v925_v45, %v927_v44  ;;  %v930_v47 = vsel %vm928_vm1, %v927_v44, %v925_v45  ;;  %1289 = vmatprep.subr.bf16.mxu0 %v1288_v42  ;;  %1322 = vmatprep.subr.bf16.mxu1 %v1288_v42 }
 0x139   : > { %v933_v48 = vsel %vm2313_vm3, %v929_v46, 0.0  ;;  %v934_v49 = vsel %vm2326_vm13, %v930_v47, 0.0  ;;  %1291 = vmatpush1.bf16.msra.mxu0 %v1290_v43  ;;  %1338 = vmatpush1.bf16.msra.mxu1 %v1290_v43 }
 0x13a   : > { %935 = vst [vmem:[#allocation2 + $0x160] sm:$0xf] %v933_v48  ;;  %936 = vst [vmem:[#allocation2 + $0x168] sm:$0xf] %v934_v49 }
 0x13b   : > { %v957_v50 = vpop.permute.xlu1 %956  ;;  %v955_v52 = vpop.permute.xlu0 %954 }
 0x13c   : > { %v959_v53 = vsel %vm958_vm2, %v955_v52, %v957_v50  ;;  %v960_v54 = vsel %vm958_vm2, %v957_v50, %v955_v52 }
 0x13d   : > { %v963_v55 = vsel %vm961_vm0, %v959_v53, 0.0  ;;  %v964_v56 = vsel %vm962_vm4, %v960_v54, 0.0 }
 0x13e   : > { %965 = vst [vmem:[#allocation2 + $0x170] sm:$0xf] %v963_v55  ;;  %966 = vst [vmem:[#allocation2 + $0x178] sm:$0xf] %v964_v56 }
 0x13f   : > { %v989_v57 = vpop.permute.xlu1 %988  ;;  %v987_v58 = vpop.permute.xlu0 %986 }
 0x140   : > { %v991_v59 = vsel %vm990_vm14, %v987_v58, %v989_v57  ;;  %v992_v60 = vsel %vm990_vm14, %v989_v57, %v987_v58 }
 0x141   : > { %v995_v61 = vsel %vm993_vm10, %v991_v59, 0.0  ;;  %v996_v62 = vsel %vm994_vm12, %v992_v60, 0.0  ;;  %v1048_v3 = vld [vmem:[#allocation2 + $0x168] sm:$0xff]  ;;  %v1047_v63 = vld [vmem:[#allocation2 + $0x160] sm:$0xff] }
 0x142   : > { %997 = vst [vmem:[#allocation2 + $0x180] sm:$0xf] %v995_v61  ;;  %998 = vst [vmem:[#allocation2 + $0x188] sm:$0xf] %v996_v62 }
 0x145   : > { %v1050_v5 = vld [vmem:[#allocation2 + $0x178] sm:$0xff]  ;;  %v1049_v7 = vld [vmem:[#allocation2 + $0x170] sm:$0xff] }
 0x146   : > { %v1292_v2 = vpack.c.bf16 %v1050_v5, %v1048_v3  ;;  %v1294_v4 = vpack.c.bf16 %v1049_v7, %v1047_v63 }
 0x148   : > { %1293 = vmatprep.subr.bf16.mxu0 %v1292_v2  ;;  %1323 = vmatprep.subr.bf16.mxu1 %v1292_v2 }
 0x149   : > { %1295 = vmatpush1.bf16.msra.mxu0 %v1294_v4  ;;  %1339 = vmatpush1.bf16.msra.mxu1 %v1294_v4  ;;  %v1052_v6 = vld [vmem:[#allocation2 + $0x188] sm:$0xff]  ;;  %v1051_v8 = vld [vmem:[#allocation2 + $0x180] sm:$0xff] }
 0x14a   : > { %v1296_v9 = vpack.c.bf16 %v1458_v51, %v1052_v6  ;;  %v1298_v10 = vpack.c.bf16 %v1458_v51, %v1051_v8  ;;  %v999_v51 = vld [vmem:[%s2368_s1] sm:$0xff] }
 0x14c   : > { %1297 = vmatprep.subr.bf16.mxu0 %v1296_v9  ;;  %1324 = vmatprep.subr.bf16.mxu1 %v1296_v9 }
 0x14d   : > { %1299 = vmatpush1.bf16.msra.mxu0 %v1298_v10  ;;  %1340 = vmatpush1.bf16.msra.mxu1 %v1298_v10 }
 0x14e   : > { %1301 = vmatprep.subr.bf16.mxu0 %v1463_v11  ;;  %1325 = vmatprep.subr.bf16.mxu1 %v1463_v11 }
 0x150   : > { %v1152_v13 = vpop.permute.xlu1 %1151  ;;  %v1147_v14 = vpop.permute.xlu0 %1146 }
 0x151   : > { %1303 = vmatpush1.bf16.msra.mxu0 %v1463_v11  ;;  %1341 = vmatpush1.bf16.msra.mxu1 %v1463_v11 }
 0x152   : > { %1305 = vmatprep.subr.bf16.mxu0 %v1463_v11  ;;  %1326 = vmatprep.subr.bf16.mxu1 %v1463_v11 }
 0x154   : > { %v1161_v21 = vpop.permute.xlu1 %1160  ;;  %v1166_v22 = vpop.permute.xlu0 %1165 }
 0x155   : > { %1307 = vmatpush1.bf16.msra.mxu0 %v1463_v11  ;;  %1342 = vmatpush1.bf16.msra.mxu1 %v1463_v11 }
 0x156   : > { %1309 = vmatprep.subr.bf16.mxu0 %v1463_v11  ;;  %1327 = vmatprep.subr.bf16.mxu1 %v1463_v11 }
 0x159   : > { %1311 = vmatpush1.bf16.msra.mxu0 %v1463_v11  ;;  %1343 = vmatpush1.bf16.msra.mxu1 %v1463_v11 }
 0x15c   : > { %1132 = vmatmul.mubr.f32.vlgmr.msra.gmra.mrb[0].mxu0 %v999_v51  ;;  %1138 = vmatmul.mubr.f32.vlgmr.msra.gmra.mrb[0].mxu1 %v1001_v12 }
 0x22f   : > { %v1133_v15 = vpop.f32.mrb[0].mxu0  ;;  %v1139_v16 = vpop.f32.mrb[0].mxu1 }
 0x230   : > { %v1154_v17 = vmul.f32 %v1147_v14, %v1133_v15  ;;  %v1156_v18 = vmul.f32 %v1152_v13, %v1139_v16  ;;  %v1135_v19 = vpop.f32.mrb[1].mxu0  ;;  %v1141_v20 = vpop.f32.mrb[1].mxu1 }
 0x231   : > { %v1155_v23 = vmul.f32 %v1147_v14, %v1135_v19  ;;  %v1157_v24 = vmul.f32 %v1152_v13, %v1141_v20 }
 0x232   : > { %v1168_v25 = vadd.f32 %v1161_v21, %v1154_v17  ;;  %v1170_v1 = vadd.f32 %v1166_v22, %v1156_v18 }
 0x233   : > { %v1169_v26 = vadd.f32 %v1161_v21, %v1155_v23  ;;  %v1171_v0 = vadd.f32 %v1166_v22, %v1157_v24 }
 0x234   : > { %v1172_v27 = vmax.f32 %v1168_v25, 0.0  ;;  %v1174_v28 = vmax.f32 %v1170_v1, 0.0 }
 0x235   : > { %v1173_v29 = vmax.f32 %v1169_v26, 0.0  ;;  %v1175_v30 = vmax.f32 %v1171_v0, 0.0 }
 0x236   : > { %1176 = vst [vmem:[%s197_s14] sm:$0xff] %v1172_v27  ;;  %1178 = vst [vmem:[%s197_s14 + $0x10] sm:$0xf] %v1174_v28 }
 0x237   : > { %1177 = vst [vmem:[%s197_s14 + $0x8] sm:$0xff] %v1173_v29  ;;  %1179 = vst [vmem:[%s197_s14 + $0x18] sm:$0xf] %v1175_v30 }
 0x238 PF: > { %s14_s15 = sadd.s32 1, %s1411_s15  }
 0x239   : > { %p11_p4 = scmp.ge.s32.totalorder %s14_s15, 4  }
 0x23b   :  { %13 = sbr.rel (!%p11_p4) target bundleno = 1 (0x1), region = 66 }

</bundles_post_ra>
